<compile_context>
chip_gen: v7x
topology: tpu7x:2x2x1
jax: 0.10.0
libtpu: 0.0.40
codegen_flags: <defaults>
</compile_context>

<pallas_src>
import functools
import math

import jax
import jax.numpy as jnp
from jax.experimental import pallas as pl
from jax.experimental.pallas import tpu as pltpu

DIM_FEEDFORWARD = 2048   # nn.TransformerEncoderLayer default
LN_EPS = 1e-5            # nn.TransformerEncoderLayer default layer_norm_eps


def _layernorm(x, gamma, beta, eps=LN_EPS):
    mu = jnp.mean(x, axis=-1, keepdims=True)
    var = jnp.mean((x - mu) * (x - mu), axis=-1, keepdims=True)
    return (x - mu) * jax.lax.rsqrt(var + eps) * gamma + beta


def fused_classifier_kernel(x_ref, wqkv_ref, bqkv_ref, wo_ref, bo_ref,
                            w1_ref, b1_ref, w2_ref, b2_ref,
                            g1_ref, be1_ref, g2_ref, be2_ref,
                            wfc_ref, bfc_ref, o_ref, h_ref, *, nhead):
    """Grid axis = encoder layer. Activation carried in h_ref (VMEM scratch)."""
    layer = pl.program_id(0)

    # Load the input activation once, at the first layer.
    @pl.when(layer == 0)
    def _():
        h_ref[...] = x_ref[...]

    x = h_ref[...]                                  # (S, D) float32
    S, D = x.shape
    hd = D // nhead
    scale = 1.0 / math.sqrt(hd)

    # Fused QKV projection (weights pre-transposed, bf16; accumulate in f32).
    qkv = jnp.dot(x.astype(jnp.bfloat16), wqkv_ref[...],
                  preferred_element_type=jnp.float32) + bqkv_ref[...]
    q = qkv[:, :D] * scale
    k = qkv[:, D:2 * D]
    v = qkv[:, 2 * D:]

    # Per-head scaled dot-product attention; head outputs kept in vregs and
    # concatenated (no VMEM scratch, no masked width-8 stores).
    heads = []
    for h in range(nhead):
        qh = q[:, h * hd:(h + 1) * hd]
        kh = k[:, h * hd:(h + 1) * hd]
        vh = v[:, h * hd:(h + 1) * hd]
        s = jax.lax.dot_general(qh, kh, (((1,), (1,)), ((), ())),
                                preferred_element_type=jnp.float32)   # (S, S)
        s = s - jnp.max(s, axis=-1, keepdims=True)
        p = jnp.exp(s)
        p = p * pl.reciprocal(jnp.sum(p, axis=-1, keepdims=True), approx=True)
        heads.append(jnp.dot(p, vh, preferred_element_type=jnp.float32))
    attn = jnp.concatenate(heads, axis=-1)                            # (S, D)

    # Output projection + residual + LayerNorm1 (post-norm).
    attn = jnp.dot(attn.astype(jnp.bfloat16), wo_ref[...],
                   preferred_element_type=jnp.float32) + bo_ref[...]
    x = _layernorm(x + attn, g1_ref[...], be1_ref[...])

    # Feed-forward (ReLU) + residual + LayerNorm2.
    ff = jnp.dot(x.astype(jnp.bfloat16), w1_ref[...],
                 preferred_element_type=jnp.float32) + b1_ref[...]
    ff = jnp.maximum(ff, 0.0)
    ff = jnp.dot(ff.astype(jnp.bfloat16), w2_ref[...],
                 preferred_element_type=jnp.float32) + b2_ref[...]
    x = _layernorm(x + ff, g2_ref[...], be2_ref[...])

    h_ref[...] = x   # carry to next layer

    # Final layer: fc + sigmoid head written straight to the output.
    @pl.when(layer == pl.num_programs(0) - 1)
    def _():
        y = jnp.dot(x, wfc_ref[...], preferred_element_type=jnp.float32) + bfc_ref[...]
        o_ref[...] = 1.0 / (1.0 + jnp.exp(-y))


def classifier_fundus_forward(x, params, nhead):
    """x: (B, latent_dim) float32 -> (B, n_classes - 1) float32.

    Single pallas_call: grid = (num_layers,), per-layer weights streamed via
    BlockSpec (double-buffered), activation resident in VMEM scratch.
    """
    S, D = x.shape
    L, _, F = params["w1_t"].shape
    C = params["wfc_t"].shape[1]

    def lspec(*shape):   # per-layer (stacked) array: pick layer `l`, squeeze it
        return pl.BlockSpec((None,) + shape, lambda l: (l,) + (0,) * len(shape))

    def cspec(*shape):   # layer-invariant array: same block every iteration
        return pl.BlockSpec(shape, lambda l: (0,) * len(shape))

    kernel = functools.partial(fused_classifier_kernel, nhead=nhead)
    return pl.pallas_call(
        kernel,
        out_shape=jax.ShapeDtypeStruct((S, C), jnp.float32),
        grid_spec=pltpu.PrefetchScalarGridSpec(
            num_scalar_prefetch=0,
            grid=(L,),
            in_specs=[
                cspec(S, D),                         # x
                lspec(D, 3 * D), lspec(1, 3 * D),    # wqkv_t, bqkv
                lspec(D, D),     lspec(1, D),        # wo_t, bo
                lspec(D, F),     lspec(1, F),        # w1_t, b1
                lspec(F, D),     lspec(1, D),        # w2_t, b2
                lspec(1, D), lspec(1, D),            # g1, be1
                lspec(1, D), lspec(1, D),            # g2, be2
                cspec(D, C),     cspec(1, C),        # wfc_t, bfc
            ],
            out_specs=cspec(S, C),
            scratch_shapes=[pltpu.VMEM((S, D), jnp.float32)],
        ),
        compiler_params=pltpu.CompilerParams(
            dimension_semantics=("arbitrary",)),     # layer axis is sequential
    )(x,
      params["wqkv_t"], params["bqkv"], params["wo_t"], params["bo"],
      params["w1_t"], params["b1"], params["w2_t"], params["b2"],
      params["g1"], params["be1"], params["g2"], params["be2"],
      params["wfc_t"], params["bfc"])


def init_params(key, latent_dim, n_classes, num_layers,
                dim_feedforward=DIM_FEEDFORWARD):
    """Weights stored stacked over layers, pre-transposed, big matrices in bf16."""
    D, F, C = latent_dim, dim_feedforward, n_classes - 1
    L = num_layers

    def stack(keys, shape, scale=0.02, dtype=jnp.bfloat16):
        w = jnp.stack([scale * jax.random.normal(k, shape, jnp.float32)
                       for k in keys])
        return w.astype(dtype)

    keys = jax.random.split(key, 4 * L + 2)
    k_qkv, k_o, k_1, k_2 = (keys[0:L], keys[L:2 * L],
                            keys[2 * L:3 * L], keys[3 * L:4 * L])
    k_fc, k_b = keys[4 * L], keys[4 * L + 1]

    params = dict(
        # (L, D, 3D) etc. — already transposed for x @ W layout.
        wqkv_t=stack(k_qkv, (D, 3 * D)),
        bqkv=jnp.zeros((L, 1, 3 * D), jnp.float32),
        wo_t=stack(k_o, (D, D)),
        bo=jnp.zeros((L, 1, D), jnp.float32),
        w1_t=stack(k_1, (D, F)),
        b1=jnp.zeros((L, 1, F), jnp.float32),
        w2_t=stack(k_2, (F, D)),
        b2=jnp.zeros((L, 1, D), jnp.float32),
        g1=jnp.ones((L, 1, D), jnp.float32),
        be1=jnp.zeros((L, 1, D), jnp.float32),
        g2=jnp.ones((L, 1, D), jnp.float32),
        be2=jnp.zeros((L, 1, D), jnp.float32),
        wfc_t=(0.02 * jax.random.normal(k_fc, (D, C), jnp.float32)),
        bfc=(0.01 * jax.random.normal(k_b, (1, C), jnp.float32)),
    )
    return params


if __name__ == "__main__":
    latent_dim = 32
    n_classes = 3
    nhead = 4
    num_encoder_layers = 2
    batch = 8

    root = jax.random.PRNGKey(0)
    k_param, k_x = jax.random.split(root)
    params = init_params(k_param, latent_dim, n_classes, num_encoder_layers)
    x = jax.random.normal(k_x, (batch, latent_dim), jnp.float32)

    out = classifier_fundus_forward(x, params, nhead)
    out = jax.block_until_ready(out)
    assert out.shape == (batch, n_classes - 1)
    assert bool(jnp.all(jnp.isfinite(out)))
    assert bool(jnp.all((out >= 0.0) & (out <= 1.0)))
    print("KERNEL_OK")
</pallas_src>

<mosaic_0001>
module attributes {stable_mosaic.version = 11 : i64} {
  func.func @fused_classifier_kernel(%arg0: i32, %arg1: memref<8x32xf32, #tpu.memory_space<vmem>>, %arg2: memref<1x32x96xbf16, #tpu.memory_space<vmem>>, %arg3: memref<1x1x96xf32, #tpu.memory_space<vmem>>, %arg4: memref<1x32x32xbf16, #tpu.memory_space<vmem>>, %arg5: memref<1x1x32xf32, #tpu.memory_space<vmem>>, %arg6: memref<1x32x2048xbf16, #tpu.memory_space<vmem>>, %arg7: memref<1x1x2048xf32, #tpu.memory_space<vmem>>, %arg8: memref<1x2048x32xbf16, #tpu.memory_space<vmem>>, %arg9: memref<1x1x32xf32, #tpu.memory_space<vmem>>, %arg10: memref<1x1x32xf32, #tpu.memory_space<vmem>>, %arg11: memref<1x1x32xf32, #tpu.memory_space<vmem>>, %arg12: memref<1x1x32xf32, #tpu.memory_space<vmem>>, %arg13: memref<1x1x32xf32, #tpu.memory_space<vmem>>, %arg14: memref<32x2xf32, #tpu.memory_space<vmem>>, %arg15: memref<1x2xf32, #tpu.memory_space<vmem>>, %arg16: memref<8x2xf32, #tpu.memory_space<vmem>>, %arg17: memref<8x32xf32, #tpu.memory_space<vmem>>) attributes {dimension_semantics = [#tpu.dimension_semantics<arbitrary>], iteration_bounds = array<i64: 2>, scalar_prefetch = 0 : i64, scratch_operands = 1 : i64, tpu.core_type = #tpu.core_type<tc>, window_params = [{pipeline_mode = #tpu.pipeline_mode<synchronous>, transform_indices = @transform_0, window_bounds = array<i64: 8, 32>}, {transform_indices = @transform_1, window_bounds = array<i64: 1, 32, 96>}, {transform_indices = @transform_2, window_bounds = array<i64: 1, 1, 96>}, {transform_indices = @transform_3, window_bounds = array<i64: 1, 32, 32>}, {transform_indices = @transform_4, window_bounds = array<i64: 1, 1, 32>}, {transform_indices = @transform_5, window_bounds = array<i64: 1, 32, 2048>}, {transform_indices = @transform_6, window_bounds = array<i64: 1, 1, 2048>}, {transform_indices = @transform_7, window_bounds = array<i64: 1, 2048, 32>}, {transform_indices = @transform_8, window_bounds = array<i64: 1, 1, 32>}, {transform_indices = @transform_9, window_bounds = array<i64: 1, 1, 32>}, {transform_indices = @transform_10, window_bounds = array<i64: 1, 1, 32>}, {transform_indices = @transform_11, window_bounds = array<i64: 1, 1, 32>}, {transform_indices = @transform_12, window_bounds = array<i64: 1, 1, 32>}, {pipeline_mode = #tpu.pipeline_mode<synchronous>, transform_indices = @transform_13, window_bounds = array<i64: 32, 2>}, {pipeline_mode = #tpu.pipeline_mode<synchronous>, transform_indices = @transform_14, window_bounds = array<i64: 1, 2>}, {pipeline_mode = #tpu.pipeline_mode<synchronous>, transform_indices = @transform_15, window_bounds = array<i64: 8, 2>}]} {
    %c0_i32 = arith.constant 0 : i32
    %0 = arith.cmpi eq, %arg0, %c0_i32 : i32
    %1 = arith.extui %0 : i1 to i32
    %c0_i32_0 = arith.constant 0 : i32
    %2 = arith.cmpi ne, %1, %c0_i32_0 : i32
    scf.if %2 {
      %c0_72 = arith.constant 0 : index
      %c0_73 = arith.constant 0 : index
      %166 = vector.load %arg1[%c0_72, %c0_73] : memref<8x32xf32, #tpu.memory_space<vmem>>, vector<8x32xf32>
      %c0_74 = arith.constant 0 : index
      %c0_75 = arith.constant 0 : index
      %167 = vector.load %arg17[%c0_74, %c0_75] : memref<8x32xf32, #tpu.memory_space<vmem>>, vector<8x32xf32>
      tpu.vector_store %arg17[%c0_74, %c0_75], %166 {strides = array<i32>} : memref<8x32xf32, #tpu.memory_space<vmem>>, vector<8x32xf32>,
    } else {
    }
    %c0 = arith.constant 0 : index
    %c0_1 = arith.constant 0 : index
    %3 = vector.load %arg17[%c0, %c0_1] : memref<8x32xf32, #tpu.memory_space<vmem>>, vector<8x32xf32>
    %4 = arith.truncf %3 : vector<8x32xf32> to vector<8x32xbf16>
    %c0_2 = arith.constant 0 : index
    %c0_3 = arith.constant 0 : index
    %c0_4 = arith.constant 0 : index
    %5 = vector.load %arg2[%c0_2, %c0_3, %c0_4] : memref<1x32x96xbf16, #tpu.memory_space<vmem>>, vector<1x32x96xbf16>
    %6 = vector.shape_cast %5 : vector<1x32x96xbf16> to vector<32x96xbf16>
    %cst = arith.constant dense<0.000000e+00> : vector<8x96xf32>
    %7 = tpu.matmul %4, %6, %cst {dimension_numbers = #tpu.dot_dimension_numbers<[1], [0], [0], [1], [0, 0, 1, 1], [], []>} : vector<8x32xbf16>, vector<32x96xbf16>, vector<8x96xf32> -> vector<8x96xf32>
    %c0_5 = arith.constant 0 : index
    %c0_6 = arith.constant 0 : index
    %c0_7 = arith.constant 0 : index
    %8 = vector.load %arg3[%c0_5, %c0_6, %c0_7] : memref<1x1x96xf32, #tpu.memory_space<vmem>>, vector<1x1x96xf32>
    %9 = vector.shape_cast %8 : vector<1x1x96xf32> to vector<1x96xf32>
    %10 = vector.broadcast %9 : vector<1x96xf32> to vector<8x96xf32>
    %11 = arith.addf %7, %10 : vector<8x96xf32>
    %12 = vector.extract_strided_slice %11 {offsets = [0, 0], sizes = [8, 32], strides = [1, 1]} : vector<8x96xf32> to vector<8x32xf32>
    %cst_8 = arith.constant 0.353553385 : f32
    %13 = vector.broadcast %cst_8 : f32 to vector<8x32xf32>
    %14 = arith.mulf %12, %13 : vector<8x32xf32>
    %15 = vector.extract_strided_slice %11 {offsets = [0, 32], sizes = [8, 32], strides = [1, 1]} : vector<8x96xf32> to vector<8x32xf32>
    %16 = vector.extract_strided_slice %11 {offsets = [0, 64], sizes = [8, 32], strides = [1, 1]} : vector<8x96xf32> to vector<8x32xf32>
    %17 = vector.extract_strided_slice %14 {offsets = [0, 0], sizes = [8, 8], strides = [1, 1]} : vector<8x32xf32> to vector<8x8xf32>
    %18 = vector.extract_strided_slice %15 {offsets = [0, 0], sizes = [8, 8], strides = [1, 1]} : vector<8x32xf32> to vector<8x8xf32>
    %19 = vector.extract_strided_slice %16 {offsets = [0, 0], sizes = [8, 8], strides = [1, 1]} : vector<8x32xf32> to vector<8x8xf32>
    %cst_9 = arith.constant dense<0.000000e+00> : vector<8x8xf32>
    %20 = tpu.matmul %17, %18, %cst_9 {dimension_numbers = #tpu.dot_dimension_numbers<[1], [1], [0], [0], [0, 0, 1, 0], [], []>} : vector<8x8xf32>, vector<8x8xf32>, vector<8x8xf32> -> vector<8x8xf32>
    %cst_10 = arith.constant dense<0xFF800000> : vector<8xf32>
    %21 = vector.multi_reduction <maximumf>, %20, %cst_10 [1] : vector<8x8xf32> to vector<8xf32>
    %22 = vector.shape_cast %21 : vector<8xf32> to vector<8x1xf32>
    %23 = vector.broadcast %22 : vector<8x1xf32> to vector<8x8xf32>
    %24 = arith.subf %20, %23 : vector<8x8xf32>
    %25 = math.exp %24 : vector<8x8xf32>
    %cst_11 = arith.constant dense<0.000000e+00> : vector<8xf32>
    %26 = vector.multi_reduction <add>, %25, %cst_11 [1] : vector<8x8xf32> to vector<8xf32>
    %27 = vector.shape_cast %26 : vector<8xf32> to vector<8x1xf32>
    %28 = tpu.reciprocal %27 {approx = true} : vector<8x1xf32> -> vector<8x1xf32>
    %29 = vector.broadcast %28 : vector<8x1xf32> to vector<8x8xf32>
    %30 = arith.mulf %25, %29 : vector<8x8xf32>
    %cst_12 = arith.constant dense<0.000000e+00> : vector<8x8xf32>
    %31 = tpu.matmul %30, %19, %cst_12 {dimension_numbers = #tpu.dot_dimension_numbers<[1], [0], [0], [1], [0, 0, 1, 1], [], []>} : vector<8x8xf32>, vector<8x8xf32>, vector<8x8xf32> -> vector<8x8xf32>
    %32 = vector.extract_strided_slice %14 {offsets = [0, 8], sizes = [8, 8], strides = [1, 1]} : vector<8x32xf32> to vector<8x8xf32>
    %33 = vector.extract_strided_slice %15 {offsets = [0, 8], sizes = [8, 8], strides = [1, 1]} : vector<8x32xf32> to vector<8x8xf32>
    %34 = vector.extract_strided_slice %16 {offsets = [0, 8], sizes = [8, 8], strides = [1, 1]} : vector<8x32xf32> to vector<8x8xf32>
    %cst_13 = arith.constant dense<0.000000e+00> : vector<8x8xf32>
    %35 = tpu.matmul %32, %33, %cst_13 {dimension_numbers = #tpu.dot_dimension_numbers<[1], [1], [0], [0], [0, 0, 1, 0], [], []>} : vector<8x8xf32>, vector<8x8xf32>, vector<8x8xf32> -> vector<8x8xf32>
    %cst_14 = arith.constant dense<0xFF800000> : vector<8xf32>
    %36 = vector.multi_reduction <maximumf>, %35, %cst_14 [1] : vector<8x8xf32> to vector<8xf32>
    %37 = vector.shape_cast %36 : vector<8xf32> to vector<8x1xf32>
    %38 = vector.broadcast %37 : vector<8x1xf32> to vector<8x8xf32>
    %39 = arith.subf %35, %38 : vector<8x8xf32>
    %40 = math.exp %39 : vector<8x8xf32>
    %cst_15 = arith.constant dense<0.000000e+00> : vector<8xf32>
    %41 = vector.multi_reduction <add>, %40, %cst_15 [1] : vector<8x8xf32> to vector<8xf32>
    %42 = vector.shape_cast %41 : vector<8xf32> to vector<8x1xf32>
    %43 = tpu.reciprocal %42 {approx = true} : vector<8x1xf32> -> vector<8x1xf32>
    %44 = vector.broadcast %43 : vector<8x1xf32> to vector<8x8xf32>
    %45 = arith.mulf %40, %44 : vector<8x8xf32>
    %cst_16 = arith.constant dense<0.000000e+00> : vector<8x8xf32>
    %46 = tpu.matmul %45, %34, %cst_16 {dimension_numbers = #tpu.dot_dimension_numbers<[1], [0], [0], [1], [0, 0, 1, 1], [], []>} : vector<8x8xf32>, vector<8x8xf32>, vector<8x8xf32> -> vector<8x8xf32>
    %47 = vector.extract_strided_slice %14 {offsets = [0, 16], sizes = [8, 8], strides = [1, 1]} : vector<8x32xf32> to vector<8x8xf32>
    %48 = vector.extract_strided_slice %15 {offsets = [0, 16], sizes = [8, 8], strides = [1, 1]} : vector<8x32xf32> to vector<8x8xf32>
    %49 = vector.extract_strided_slice %16 {offsets = [0, 16], sizes = [8, 8], strides = [1, 1]} : vector<8x32xf32> to vector<8x8xf32>
    %cst_17 = arith.constant dense<0.000000e+00> : vector<8x8xf32>
    %50 = tpu.matmul %47, %48, %cst_17 {dimension_numbers = #tpu.dot_dimension_numbers<[1], [1], [0], [0], [0, 0, 1, 0], [], []>} : vector<8x8xf32>, vector<8x8xf32>, vector<8x8xf32> -> vector<8x8xf32>
    %cst_18 = arith.constant dense<0xFF800000> : vector<8xf32>
    %51 = vector.multi_reduction <maximumf>, %50, %cst_18 [1] : vector<8x8xf32> to vector<8xf32>
    %52 = vector.shape_cast %51 : vector<8xf32> to vector<8x1xf32>
    %53 = vector.broadcast %52 : vector<8x1xf32> to vector<8x8xf32>
    %54 = arith.subf %50, %53 : vector<8x8xf32>
    %55 = math.exp %54 : vector<8x8xf32>
    %cst_19 = arith.constant dense<0.000000e+00> : vector<8xf32>
    %56 = vector.multi_reduction <add>, %55, %cst_19 [1] : vector<8x8xf32> to vector<8xf32>
    %57 = vector.shape_cast %56 : vector<8xf32> to vector<8x1xf32>
    %58 = tpu.reciprocal %57 {approx = true} : vector<8x1xf32> -> vector<8x1xf32>
    %59 = vector.broadcast %58 : vector<8x1xf32> to vector<8x8xf32>
    %60 = arith.mulf %55, %59 : vector<8x8xf32>
    %cst_20 = arith.constant dense<0.000000e+00> : vector<8x8xf32>
    %61 = tpu.matmul %60, %49, %cst_20 {dimension_numbers = #tpu.dot_dimension_numbers<[1], [0], [0], [1], [0, 0, 1, 1], [], []>} : vector<8x8xf32>, vector<8x8xf32>, vector<8x8xf32> -> vector<8x8xf32>
    %62 = vector.extract_strided_slice %14 {offsets = [0, 24], sizes = [8, 8], strides = [1, 1]} : vector<8x32xf32> to vector<8x8xf32>
    %63 = vector.extract_strided_slice %15 {offsets = [0, 24], sizes = [8, 8], strides = [1, 1]} : vector<8x32xf32> to vector<8x8xf32>
    %64 = vector.extract_strided_slice %16 {offsets = [0, 24], sizes = [8, 8], strides = [1, 1]} : vector<8x32xf32> to vector<8x8xf32>
    %cst_21 = arith.constant dense<0.000000e+00> : vector<8x8xf32>
    %65 = tpu.matmul %62, %63, %cst_21 {dimension_numbers = #tpu.dot_dimension_numbers<[1], [1], [0], [0], [0, 0, 1, 0], [], []>} : vector<8x8xf32>, vector<8x8xf32>, vector<8x8xf32> -> vector<8x8xf32>
    %cst_22 = arith.constant dense<0xFF800000> : vector<8xf32>
    %66 = vector.multi_reduction <maximumf>, %65, %cst_22 [1] : vector<8x8xf32> to vector<8xf32>
    %67 = vector.shape_cast %66 : vector<8xf32> to vector<8x1xf32>
    %68 = vector.broadcast %67 : vector<8x1xf32> to vector<8x8xf32>
    %69 = arith.subf %65, %68 : vector<8x8xf32>
    %70 = math.exp %69 : vector<8x8xf32>
    %cst_23 = arith.constant dense<0.000000e+00> : vector<8xf32>
    %71 = vector.multi_reduction <add>, %70, %cst_23 [1] : vector<8x8xf32> to vector<8xf32>
    %72 = vector.shape_cast %71 : vector<8xf32> to vector<8x1xf32>
    %73 = tpu.reciprocal %72 {approx = true} : vector<8x1xf32> -> vector<8x1xf32>
    %74 = vector.broadcast %73 : vector<8x1xf32> to vector<8x8xf32>
    %75 = arith.mulf %70, %74 : vector<8x8xf32>
    %cst_24 = arith.constant dense<0.000000e+00> : vector<8x8xf32>
    %76 = tpu.matmul %75, %64, %cst_24 {dimension_numbers = #tpu.dot_dimension_numbers<[1], [0], [0], [1], [0, 0, 1, 1], [], []>} : vector<8x8xf32>, vector<8x8xf32>, vector<8x8xf32> -> vector<8x8xf32>
    %77 = tpu.concatenate %31, %46, %61, %76 in 1 : vector<8x8xf32>, vector<8x8xf32>, vector<8x8xf32>, vector<8x8xf32> -> vector<8x32xf32>
    %78 = arith.truncf %77 : vector<8x32xf32> to vector<8x32xbf16>
    %c0_25 = arith.constant 0 : index
    %c0_26 = arith.constant 0 : index
    %c0_27 = arith.constant 0 : index
    %79 = vector.load %arg4[%c0_25, %c0_26, %c0_27] : memref<1x32x32xbf16, #tpu.memory_space<vmem>>, vector<1x32x32xbf16>
    %80 = vector.shape_cast %79 : vector<1x32x32xbf16> to vector<32x32xbf16>
    %cst_28 = arith.constant dense<0.000000e+00> : vector<8x32xf32>
    %81 = tpu.matmul %78, %80, %cst_28 {dimension_numbers = #tpu.dot_dimension_numbers<[1], [0], [0], [1], [0, 0, 1, 1], [], []>} : vector<8x32xbf16>, vector<32x32xbf16>, vector<8x32xf32> -> vector<8x32xf32>
    %c0_29 = arith.constant 0 : index
    %c0_30 = arith.constant 0 : index
    %c0_31 = arith.constant 0 : index
    %82 = vector.load %arg5[%c0_29, %c0_30, %c0_31] : memref<1x1x32xf32, #tpu.memory_space<vmem>>, vector<1x1x32xf32>
    %83 = vector.shape_cast %82 : vector<1x1x32xf32> to vector<1x32xf32>
    %84 = vector.broadcast %83 : vector<1x32xf32> to vector<8x32xf32>
    %85 = arith.addf %81, %84 : vector<8x32xf32>
    %86 = arith.addf %3, %85 : vector<8x32xf32>
    %c0_32 = arith.constant 0 : index
    %c0_33 = arith.constant 0 : index
    %c0_34 = arith.constant 0 : index
    %87 = vector.load %arg10[%c0_32, %c0_33, %c0_34] : memref<1x1x32xf32, #tpu.memory_space<vmem>>, vector<1x1x32xf32>
    %88 = vector.shape_cast %87 : vector<1x1x32xf32> to vector<1x32xf32>
    %c0_35 = arith.constant 0 : index
    %c0_36 = arith.constant 0 : index
    %c0_37 = arith.constant 0 : index
    %89 = vector.load %arg11[%c0_35, %c0_36, %c0_37] : memref<1x1x32xf32, #tpu.memory_space<vmem>>, vector<1x1x32xf32>
    %90 = vector.shape_cast %89 : vector<1x1x32xf32> to vector<1x32xf32>
    %cst_38 = arith.constant dense<0.000000e+00> : vector<8xf32>
    %91 = vector.multi_reduction <add>, %86, %cst_38 [1] : vector<8x32xf32> to vector<8xf32>
    %92 = vector.shape_cast %91 : vector<8xf32> to vector<8x1xf32>
    %cst_39 = arith.constant 3.200000e+01 : f32
    %93 = vector.broadcast %cst_39 : f32 to vector<8x1xf32>
    %94 = arith.divf %92, %93 : vector<8x1xf32>
    %95 = vector.broadcast %94 : vector<8x1xf32> to vector<8x32xf32>
    %96 = arith.subf %86, %95 : vector<8x32xf32>
    %97 = vector.broadcast %94 : vector<8x1xf32> to vector<8x32xf32>
    %98 = arith.subf %86, %97 : vector<8x32xf32>
    %99 = arith.mulf %96, %98 : vector<8x32xf32>
    %cst_40 = arith.constant dense<0.000000e+00> : vector<8xf32>
    %100 = vector.multi_reduction <add>, %99, %cst_40 [1] : vector<8x32xf32> to vector<8xf32>
    %101 = vector.shape_cast %100 : vector<8xf32> to vector<8x1xf32>
    %cst_41 = arith.constant 3.200000e+01 : f32
    %102 = vector.broadcast %cst_41 : f32 to vector<8x1xf32>
    %103 = arith.divf %101, %102 : vector<8x1xf32>
    %104 = vector.broadcast %94 : vector<8x1xf32> to vector<8x32xf32>
    %105 = arith.subf %86, %104 : vector<8x32xf32>
    %cst_42 = arith.constant 9.99999974E-6 : f32
    %106 = vector.broadcast %cst_42 : f32 to vector<8x1xf32>
    %107 = arith.addf %103, %106 : vector<8x1xf32>
    %108 = math.rsqrt %107 : vector<8x1xf32>
    %109 = vector.broadcast %108 : vector<8x1xf32> to vector<8x32xf32>
    %110 = arith.mulf %105, %109 : vector<8x32xf32>
    %111 = vector.broadcast %88 : vector<1x32xf32> to vector<8x32xf32>
    %112 = arith.mulf %110, %111 : vector<8x32xf32>
    %113 = vector.broadcast %90 : vector<1x32xf32> to vector<8x32xf32>
    %114 = arith.addf %112, %113 : vector<8x32xf32>
    %115 = arith.truncf %114 : vector<8x32xf32> to vector<8x32xbf16>
    %c0_43 = arith.constant 0 : index
    %c0_44 = arith.constant 0 : index
    %c0_45 = arith.constant 0 : index
    %116 = vector.load %arg6[%c0_43, %c0_44, %c0_45] : memref<1x32x2048xbf16, #tpu.memory_space<vmem>>, vector<1x32x2048xbf16>
    %117 = vector.shape_cast %116 : vector<1x32x2048xbf16> to vector<32x2048xbf16>
    %cst_46 = arith.constant dense<0.000000e+00> : vector<8x2048xf32>
    %118 = tpu.matmul %115, %117, %cst_46 {dimension_numbers = #tpu.dot_dimension_numbers<[1], [0], [0], [1], [0, 0, 1, 1], [], []>} : vector<8x32xbf16>, vector<32x2048xbf16>, vector<8x2048xf32> -> vector<8x2048xf32>
    %c0_47 = arith.constant 0 : index
    %c0_48 = arith.constant 0 : index
    %c0_49 = arith.constant 0 : index
    %119 = vector.load %arg7[%c0_47, %c0_48, %c0_49] : memref<1x1x2048xf32, #tpu.memory_space<vmem>>, vector<1x1x2048xf32>
    %120 = vector.shape_cast %119 : vector<1x1x2048xf32> to vector<1x2048xf32>
    %121 = vector.broadcast %120 : vector<1x2048xf32> to vector<8x2048xf32>
    %122 = arith.addf %118, %121 : vector<8x2048xf32>
    %cst_50 = arith.constant 0.000000e+00 : f32
    %123 = vector.broadcast %cst_50 : f32 to vector<8x2048xf32>
    %124 = arith.maximumf %122, %123 : vector<8x2048xf32>
    %125 = arith.truncf %124 : vector<8x2048xf32> to vector<8x2048xbf16>
    %c0_51 = arith.constant 0 : index
    %c0_52 = arith.constant 0 : index
    %c0_53 = arith.constant 0 : index
    %126 = vector.load %arg8[%c0_51, %c0_52, %c0_53] : memref<1x2048x32xbf16, #tpu.memory_space<vmem>>, vector<1x2048x32xbf16>
    %127 = vector.shape_cast %126 : vector<1x2048x32xbf16> to vector<2048x32xbf16>
    %cst_54 = arith.constant dense<0.000000e+00> : vector<8x32xf32>
    %128 = tpu.matmul %125, %127, %cst_54 {dimension_numbers = #tpu.dot_dimension_numbers<[1], [0], [0], [1], [0, 0, 1, 1], [], []>} : vector<8x2048xbf16>, vector<2048x32xbf16>, vector<8x32xf32> -> vector<8x32xf32>
    %c0_55 = arith.constant 0 : index
    %c0_56 = arith.constant 0 : index
    %c0_57 = arith.constant 0 : index
    %129 = vector.load %arg9[%c0_55, %c0_56, %c0_57] : memref<1x1x32xf32, #tpu.memory_space<vmem>>, vector<1x1x32xf32>
    %130 = vector.shape_cast %129 : vector<1x1x32xf32> to vector<1x32xf32>
    %131 = vector.broadcast %130 : vector<1x32xf32> to vector<8x32xf32>
    %132 = arith.addf %128, %131 : vector<8x32xf32>
    %133 = arith.addf %114, %132 : vector<8x32xf32>
    %c0_58 = arith.constant 0 : index
    %c0_59 = arith.constant 0 : index
    %c0_60 = arith.constant 0 : index
    %134 = vector.load %arg12[%c0_58, %c0_59, %c0_60] : memref<1x1x32xf32, #tpu.memory_space<vmem>>, vector<1x1x32xf32>
    %135 = vector.shape_cast %134 : vector<1x1x32xf32> to vector<1x32xf32>
    %c0_61 = arith.constant 0 : index
    %c0_62 = arith.constant 0 : index
    %c0_63 = arith.constant 0 : index
    %136 = vector.load %arg13[%c0_61, %c0_62, %c0_63] : memref<1x1x32xf32, #tpu.memory_space<vmem>>, vector<1x1x32xf32>
    %137 = vector.shape_cast %136 : vector<1x1x32xf32> to vector<1x32xf32>
    %cst_64 = arith.constant dense<0.000000e+00> : vector<8xf32>
    %138 = vector.multi_reduction <add>, %133, %cst_64 [1] : vector<8x32xf32> to vector<8xf32>
    %139 = vector.shape_cast %138 : vector<8xf32> to vector<8x1xf32>
    %cst_65 = arith.constant 3.200000e+01 : f32
    %140 = vector.broadcast %cst_65 : f32 to vector<8x1xf32>
    %141 = arith.divf %139, %140 : vector<8x1xf32>
    %142 = vector.broadcast %141 : vector<8x1xf32> to vector<8x32xf32>
    %143 = arith.subf %133, %142 : vector<8x32xf32>
    %144 = vector.broadcast %141 : vector<8x1xf32> to vector<8x32xf32>
    %145 = arith.subf %133, %144 : vector<8x32xf32>
    %146 = arith.mulf %143, %145 : vector<8x32xf32>
    %cst_66 = arith.constant dense<0.000000e+00> : vector<8xf32>
    %147 = vector.multi_reduction <add>, %146, %cst_66 [1] : vector<8x32xf32> to vector<8xf32>
    %148 = vector.shape_cast %147 : vector<8xf32> to vector<8x1xf32>
    %cst_67 = arith.constant 3.200000e+01 : f32
    %149 = vector.broadcast %cst_67 : f32 to vector<8x1xf32>
    %150 = arith.divf %148, %149 : vector<8x1xf32>
    %151 = vector.broadcast %141 : vector<8x1xf32> to vector<8x32xf32>
    %152 = arith.subf %133, %151 : vector<8x32xf32>
    %cst_68 = arith.constant 9.99999974E-6 : f32
    %153 = vector.broadcast %cst_68 : f32 to vector<8x1xf32>
    %154 = arith.addf %150, %153 : vector<8x1xf32>
    %155 = math.rsqrt %154 : vector<8x1xf32>
    %156 = vector.broadcast %155 : vector<8x1xf32> to vector<8x32xf32>
    %157 = arith.mulf %152, %156 : vector<8x32xf32>
    %158 = vector.broadcast %135 : vector<1x32xf32> to vector<8x32xf32>
    %159 = arith.mulf %157, %158 : vector<8x32xf32>
    %160 = vector.broadcast %137 : vector<1x32xf32> to vector<8x32xf32>
    %161 = arith.addf %159, %160 : vector<8x32xf32>
    %c0_69 = arith.constant 0 : index
    %c0_70 = arith.constant 0 : index
    %162 = vector.load %arg17[%c0_69, %c0_70] : memref<8x32xf32, #tpu.memory_space<vmem>>, vector<8x32xf32>
    tpu.vector_store %arg17[%c0_69, %c0_70], %161 {strides = array<i32>} : memref<8x32xf32, #tpu.memory_space<vmem>>, vector<8x32xf32>,
    %c1_i32 = arith.constant 1 : i32
    %163 = arith.cmpi eq, %arg0, %c1_i32 : i32
    %164 = arith.extui %163 : i1 to i32
    %c0_i32_71 = arith.constant 0 : i32
    %165 = arith.cmpi ne, %164, %c0_i32_71 : i32
    scf.if %165 {
      %c0_72 = arith.constant 0 : index
      %c0_73 = arith.constant 0 : index
      %166 = vector.load %arg14[%c0_72, %c0_73] : memref<32x2xf32, #tpu.memory_space<vmem>>, vector<32x2xf32>
      %cst_74 = arith.constant dense<0.000000e+00> : vector<8x2xf32>
      %167 = tpu.matmul %161, %166, %cst_74 {dimension_numbers = #tpu.dot_dimension_numbers<[1], [0], [0], [1], [0, 0, 1, 1], [], []>} : vector<8x32xf32>, vector<32x2xf32>, vector<8x2xf32> -> vector<8x2xf32>
      %c0_75 = arith.constant 0 : index
      %c0_76 = arith.constant 0 : index
      %168 = vector.load %arg15[%c0_75, %c0_76] : memref<1x2xf32, #tpu.memory_space<vmem>>, vector<1x2xf32>
      %169 = vector.broadcast %168 : vector<1x2xf32> to vector<8x2xf32>
      %170 = arith.addf %167, %169 : vector<8x2xf32>
      %cst_77 = arith.constant 0.000000e+00 : f32
      %171 = vector.broadcast %cst_77 : f32 to vector<8x2xf32>
      %172 = arith.subf %171, %170 : vector<8x2xf32>
      %173 = math.exp %172 : vector<8x2xf32>
      %cst_78 = arith.constant 1.000000e+00 : f32
      %174 = vector.broadcast %cst_78 : f32 to vector<8x2xf32>
      %175 = arith.addf %174, %173 : vector<8x2xf32>
      %cst_79 = arith.constant 1.000000e+00 : f32
      %176 = vector.broadcast %cst_79 : f32 to vector<8x2xf32>
      %177 = arith.divf %176, %175 : vector<8x2xf32>
      %c0_80 = arith.constant 0 : index
      %c0_81 = arith.constant 0 : index
      %178 = vector.load %arg16[%c0_80, %c0_81] : memref<8x2xf32, #tpu.memory_space<vmem>>, vector<8x2xf32>
      tpu.vector_store %arg16[%c0_80, %c0_81], %177 {strides = array<i32>} : memref<8x2xf32, #tpu.memory_space<vmem>>, vector<8x2xf32>,
    } else {
    }
    return
  }
  func.func @transform_0(%arg0: i32) -> (i32, i32) {
    %c0_i32 = arith.constant 0 : i32
    %c0_i32_0 = arith.constant 0 : i32
    %c0_i32_1 = arith.constant 0 : i32
    return %c0_i32, %c0_i32_0 : i32, i32
  }
  func.func @transform_1(%arg0: i32) -> (i32, i32, i32) {
    %c0_i32 = arith.constant 0 : i32
    %c0_i32_0 = arith.constant 0 : i32
    %c0_i32_1 = arith.constant 0 : i32
    return %arg0, %c0_i32, %c0_i32_0 : i32, i32, i32
  }
  func.func @transform_2(%arg0: i32) -> (i32, i32, i32) {
    %c0_i32 = arith.constant 0 : i32
    %c0_i32_0 = arith.constant 0 : i32
    %c0_i32_1 = arith.constant 0 : i32
    return %arg0, %c0_i32, %c0_i32_0 : i32, i32, i32
  }
  func.func @transform_3(%arg0: i32) -> (i32, i32, i32) {
    %c0_i32 = arith.constant 0 : i32
    %c0_i32_0 = arith.constant 0 : i32
    %c0_i32_1 = arith.constant 0 : i32
    return %arg0, %c0_i32, %c0_i32_0 : i32, i32, i32
  }
  func.func @transform_4(%arg0: i32) -> (i32, i32, i32) {
    %c0_i32 = arith.constant 0 : i32
    %c0_i32_0 = arith.constant 0 : i32
    %c0_i32_1 = arith.constant 0 : i32
    return %arg0, %c0_i32, %c0_i32_0 : i32, i32, i32
  }
  func.func @transform_5(%arg0: i32) -> (i32, i32, i32) {
    %c0_i32 = arith.constant 0 : i32
    %c0_i32_0 = arith.constant 0 : i32
    %c0_i32_1 = arith.constant 0 : i32
    return %arg0, %c0_i32, %c0_i32_0 : i32, i32, i32
  }
  func.func @transform_6(%arg0: i32) -> (i32, i32, i32) {
    %c0_i32 = arith.constant 0 : i32
    %c0_i32_0 = arith.constant 0 : i32
    %c0_i32_1 = arith.constant 0 : i32
    return %arg0, %c0_i32, %c0_i32_0 : i32, i32, i32
  }
  func.func @transform_7(%arg0: i32) -> (i32, i32, i32) {
    %c0_i32 = arith.constant 0 : i32
    %c0_i32_0 = arith.constant 0 : i32
    %c0_i32_1 = arith.constant 0 : i32
    return %arg0, %c0_i32, %c0_i32_0 : i32, i32, i32
  }
  func.func @transform_8(%arg0: i32) -> (i32, i32, i32) {
    %c0_i32 = arith.constant 0 : i32
    %c0_i32_0 = arith.constant 0 : i32
    %c0_i32_1 = arith.constant 0 : i32
    return %arg0, %c0_i32, %c0_i32_0 : i32, i32, i32
  }
  func.func @transform_9(%arg0: i32) -> (i32, i32, i32) {
    %c0_i32 = arith.constant 0 : i32
    %c0_i32_0 = arith.constant 0 : i32
    %c0_i32_1 = arith.constant 0 : i32
    return %arg0, %c0_i32, %c0_i32_0 : i32, i32, i32
  }
  func.func @transform_10(%arg0: i32) -> (i32, i32, i32) {
    %c0_i32 = arith.constant 0 : i32
    %c0_i32_0 = arith.constant 0 : i32
    %c0_i32_1 = arith.constant 0 : i32
    return %arg0, %c0_i32, %c0_i32_0 : i32, i32, i32
  }
  func.func @transform_11(%arg0: i32) -> (i32, i32, i32) {
    %c0_i32 = arith.constant 0 : i32
    %c0_i32_0 = arith.constant 0 : i32
    %c0_i32_1 = arith.constant 0 : i32
    return %arg0, %c0_i32, %c0_i32_0 : i32, i32, i32
  }
  func.func @transform_12(%arg0: i32) -> (i32, i32, i32) {
    %c0_i32 = arith.constant 0 : i32
    %c0_i32_0 = arith.constant 0 : i32
    %c0_i32_1 = arith.constant 0 : i32
    return %arg0, %c0_i32, %c0_i32_0 : i32, i32, i32
  }
  func.func @transform_13(%arg0: i32) -> (i32, i32) {
    %c0_i32 = arith.constant 0 : i32
    %c0_i32_0 = arith.constant 0 : i32
    %c0_i32_1 = arith.constant 0 : i32
    return %c0_i32, %c0_i32_0 : i32, i32
  }
  func.func @transform_14(%arg0: i32) -> (i32, i32) {
    %c0_i32 = arith.constant 0 : i32
    %c0_i32_0 = arith.constant 0 : i32
    %c0_i32_1 = arith.constant 0 : i32
    return %c0_i32, %c0_i32_0 : i32, i32
  }
  func.func @transform_15(%arg0: i32) -> (i32, i32) {
    %c0_i32 = arith.constant 0 : i32
    %c0_i32_0 = arith.constant 0 : i32
    %c0_i32_1 = arith.constant 0 : i32
    return %c0_i32, %c0_i32_0 : i32, i32
  }
}

</mosaic_0001>

<bundles_post_ra>
// kernel: tpu_custom_call.1
= control target key start
LH: loop header
LB: loop body
LE: loop exit
PB: predicated region body
PF: predicated region fallthrough
CT: control target
= control target key end

     0   :  { %s4550_s18 = smov 0   ;;  %s5031_s0 = inlined_call_operand.vmem [shape: f32[8,32], index: 0, kind: input, shape index: {}]   ;;  %s5032_s1 = inlined_call_operand.vmem [shape: bf16[2,32,96], index: 1, kind: input, shape index: {}]   ;;  %s5033_s2 = inlined_call_operand.vmem [shape: f32[2,1,96], index: 2, kind: input, shape index: {}]   ;;  %s5034_s3 = inlined_call_operand.vmem [shape: bf16[2,32,32], index: 3, kind: input, shape index: {}]   ;;  %s5035_s4 = inlined_call_operand.vmem [shape: f32[2,1,32], index: 4, kind: input, shape index: {}]   ;;  %s5036_s5 = inlined_call_operand.vmem [shape: bf16[2,32,2048], index: 5, kind: input, shape index: {}]   ;;  %s5037_s6 = inlined_call_operand.vmem [shape: f32[2,1,2048], index: 6, kind: input, shape index: {}]   ;;  %s5038_s7 = inlined_call_operand.vmem [shape: bf16[2,2048,32], index: 7, kind: input, shape index: {}]   ;;  %s5039_s8 = inlined_call_operand.vmem [shape: f32[2,1,32], index: 8, kind: input, shape index: {}]   ;;  %s5040_s9 = inlined_call_operand.vmem [shape: f32[2,1,32], index: 9, kind: input, shape index: {}]   ;;  %s5041_s10 = inlined_call_operand.vmem [shape: f32[2,1,32], index: 10, kind: input, shape index: {}]   ;;  %s5042_s11 = inlined_call_operand.vmem [shape: f32[2,1,32], index: 11, kind: input, shape index: {}]   ;;  %s5043_s12 = inlined_call_operand.vmem [shape: f32[2,1,32], index: 12, kind: input, shape index: {}]   ;;  %s5044_s13 = inlined_call_operand.vmem [shape: f32[32,2], index: 13, kind: input, shape index: {}]   ;;  %s5045_s14 = inlined_call_operand.vmem [shape: f32[1,2], index: 14, kind: input, shape index: {}]   ;;  %s5046_s15 = inlined_call_operand.vmem [shape: f32[8,2], index: 15, kind: output, shape index: {}]  }
   0x1   :  { %5049 = sst [smem:[#allocation4_spill]] %s5031_s0 }
   0x2   :  { %5050 = sst [smem:[#allocation5_spill]] %s5032_s1 }
   0x3   :  { %5051 = sst [smem:[#allocation6_spill]] %s5034_s3 }
   0x4   :  { %5052 = sst [smem:[#allocation7_spill]] %s5036_s5 }
   0x5   :  { %5053 = sst [smem:[#allocation8_spill]] %s5037_s6 }
   0x6   :  { %5054 = sst [smem:[#allocation9_spill]] %s5044_s13 }
   0x7   :  { %5055 = sst [smem:[#allocation10_spill]] %s5045_s14 }
   0x8   :  { %5056 = sst [smem:[#allocation11_spill]] %s5046_s15 }
   0x9 LB: > { %5057 = sst [smem:[#allocation3_spill]] %s4448_s18  ;;  %s4556_s19 = sadd.s32 4294967295, %s4448_s18   ;;  %s4448_s18 = sphi %s4550_s18, %s25_s18  }
   0xa   : > { %p3769_p0 = scmp.ge.s32.totalorder %s4448_s18, 1  ;;  %p527_p1 = scmp.lt.s32.totalorder %s4448_s18, 3 }
   0xc   : > { %p528_p2 = pnand %p3769_p0, %p527_p1 }
   0xd   : > { %p610_p3 = scmp.lt.s32.totalorder (!%p528_p2), %s4556_s19, 1  ;;  %s5058_s1 = sld [smem:[#allocation5_spill]] (!%p528_p2) }
   0xe   : > { %531 = sbr.rel (%p528_p2) target bundleno = 3397 (0xd45), region = 80  ;;  %s5059_s3 = sld [smem:[#allocation6_spill]] (!%p528_p2) }
   0xf   : > { %s5060_s5 = sld [smem:[#allocation7_spill]] (!%p528_p2)  ;;  %s5061_s6 = sld [smem:[#allocation8_spill]] (!%p528_p2) }
  0x10   : > { %p3779_p4 = scmp.ne.s32.totalorder (!%p528_p2), %s4556_s19, 0 }
  0x15   : > { %s4562_s20 = scalar_select %p610_p3, %s4556_s19, 1 }
  0x16   : > { %vm661_vm0 = vcmask (!%p3779_p4), 261120  }
  0x17   : > { %s3978_s21 = sshll.u32 %s4562_s20, 4  ;;  %s3980_s15 = sshll.u32 %s4562_s20, 8 }
  0x18   : > { %s614_s27 = scalar_lea.vmem %s5058_s1, %s3978_s21  ;;  %s4575_s30 = scalar_lea.vmem %s5059_s3, %s3978_s21 }
  0x19   : > { %s4585_s0 = scalar_lea.vmem %s5060_s5, %s3980_s15  ;;  %s4590_s25 = scalar_lea.vmem %s5061_s6, %s3978_s21 }
  0x1a   : > { %s3981_s26 = sshll.u32 %s4562_s20, 10  ;;  %s642_s29 = scalar_lea.vmem %s5039_s8, %s4562_s20 }
  0x1b   : > { %s4600_s16 = scalar_lea.vmem %s5038_s7, %s3981_s26  ;;  %s645_s13 = scalar_lea.vmem %s5040_s9, %s4562_s20 }
  0x1c   : > { %s648_s22 = scalar_lea.vmem %s5041_s10, %s4562_s20  ;;  %s651_s5 = scalar_lea.vmem %s5042_s11, %s4562_s20 }
  0x1d   : > { %s654_s28 = scalar_lea.vmem %s5043_s12, %s4562_s20  ;;  %659 = sbr.rel (%p3779_p4) target bundleno = 38 (0x26), region = 84 }
  0x1e   : > { %s5062_s26 = sld [smem:[#allocation4_spill]] (!%p3779_p4) }
  0x24   : > { %v660_v0 = vld [vmem:[%s5062_s26] sm:$0xff] }
  0x25   : > { %662 = vst.msk [vmem:[#allocation2] sm:$0xff] %vm661_vm0, %v660_v0 }
  0x26 PF: > { %v4286_v1 = vld [vmem:[%s614_s27] sm:$0xff]   ;;  %v4450_v2 = vmov 0.0   ;;  %v4287_v3 = vld [vmem:[%s614_s27 + $0x8] sm:$0xff]   ;;  %vm4451_vm1 = vmmov 0   ;;  %vm688_vm2 = vcmask 261120   ;;  %s5063_s27 = scalar_lea.vmem %s5033_s2, %s4562_s20  ;;  %s4452_s17 = smov 64  }
  0x27   : > { %4185 = vmatprep.subr.bf16.mxu0 %v4450_v2  ;;  %4193 = vmatprep.subr.mxu1 %v4450_v2  ;;  %v3780_v6 = vld [vmem:[%s5063_s27] ss:$0 sm:$0xff]  ;;  %s4453_s14 = smov 96   ;;  %s4454_s15 = smov 88   ;;  %vm736_vm3 = vcmask 64512   ;;  %vm1407_vm4 = vcmask 130048  }
  0x28   : > { %4186 = vmatpush3.bf16.msra.mxu0 %v4286_v1  ;;  %4189 = vmatprep.mubr.msk.bf16.mxu0 %vm4451_vm1, %v4450_v2  ;;  %s4455_s21 = smov 120   ;;  %s4456_s23 = smov 80   ;;  %vm1409_vm5 = vcmask 195584  }
  0x29   : > { %4187 = vmatprep.subr.bf16.mxu0 %v4450_v2  ;;  %4195 = vmatprep.mubr.msk.f32.mxu1 %vm4451_vm1, %v4450_v2  ;;  %s4457_s24 = smov 72   ;;  %s4458_s1 = smov 112  }
  0x2a   : > { %s4459_s3 = smov 104   ;;  %s4460_s26 = smov 56  }
  0x2b   : > { %s4461_s6 = smov 40   ;;  %s4462_s18 = smov 48  }
  0x2c   : > { %v4626_v4 = vld [vmem:[#allocation2] sm:$0xff]  ;;  %4188 = vmatpush3.bf16.msra.mxu0 %v4287_v3  ;;  %s4463_s27 = smov 8   ;;  %p3973_p5 = scmp.ne.s32.totalorder %s4556_s19, 1 }
  0x2d   : > { %v664_v5 = vpack.c.bf16 %v4626_v4, %v4626_v4  ;;  %4208 = vmatprep.subr.mxu0 %v4450_v2  ;;  %vm4468_vm6 = vmmov (!%p3973_p5), 0   ;;  %vm3625_vm7 = vcmask (!%p3973_p5), 15360  }
  0x2f   : > { %4190 = vmatmul.mubr.msk.bf16.vlgmr.msra.gmra.mrb[0].mxu0 %vm688_vm2, %v664_v5 }
  0x30   : > { %4210 = vmatprep.mubr.msk.f32.mxu0 %vm4451_vm1, %v4450_v2 }
 0x102   : > { %v726_v7 = vpop.f32.mrb[0].mxu0 }
 0x103   : > { %v4642_v8 = vadd.f32 %v3780_v6, %v726_v7  ;;  %v4191_v9 = vpop.f32.mrb[1].mxu0 }
 0x104   : > { %v729_v10 = vpop.f32.mrb[2].mxu0  ;;  %v4289_v9 = vld [vmem:[%s4575_s30 + $0x8] sm:$0xff]  }
 0x105   : > { %823 = vrot.lane.b32.xlu1 %v4642_v8, %s4452_s17  ;;  %734 = vrot.lane.b32.xlu0 %v4642_v8, %s4453_s14  ;;  %v4192_v11 = vpop.f32.mrb[3].mxu0  ;;  %v732_v12 = vmul.f32 0.35355338, %v4642_v8  ;;  %s4464_s17 = smov 16   ;;  %s4465_s14 = smov 24  }
 0x109   : > { %901 = vrot.lane.b32.xlu1 %v4642_v8, %s4454_s15 }
 0x10d   : > { %899 = vrot.lane.b32.xlu1 %v732_v12, %s4455_s21  ;;  %s5064_s21 = scalar_lea.vmem %s5035_s4, %s4562_s20 }
 0x111   : > { %1066 = vrot.lane.b32.xlu1 %v4642_v8, %s4456_s23 }
 0x177   : > { %v735_v13 = vpop.permute.xlu0 %734  ;;  %v824_v14 = vpop.permute.xlu1 %823 }
 0x178   : > { %4194 = vmatpush3.xpose.msk.msra.mxu1 %vm736_vm3, %v735_v13 }
 0x179   : > { %4198 = vmatprep.subr.mxu1 %v4450_v2 }
 0x17b   : > { %4196 = vmatmul.mubr.msk.f32.vlgmr.msra.gmra.mrb[0].mxu1 %vm736_vm3, %v732_v12  ;;  %v902_v23 = vpop.permute.xlu1 %901 }
 0x17c   : > { %4199 = vmatpush3.msra.mxu1 %v824_v14  ;;  %4200 = vmatprep.mubr.msk.f32.mxu1 %vm4451_vm1, %v4450_v2 }
 0x17d   : > { %4203 = vmatprep.subr.mxu1 %v4450_v2 }
 0x17f   : > { %v900_v24 = vpop.permute.xlu1 %899 }
 0x183   : > { %v1067_v25 = vpop.permute.xlu1 %1066 }
 0x24e   : > { %v808_v15 = vpop.f32.mrb[0].mxu1 }
 0x24f   : > { %v4197_v16 = vpop.f32.mrb[1].mxu1  ;;  %v812_v17 = vsel %vm736_vm3, %v808_v15, -inf }
 0x250   : > { %813 = vmax.xlane.f32.xlu0 %v812_v17 }
 0x266   : > { %1231 = vrot.lane.b32.xlu0 %v4642_v8, %s4457_s24 }
 0x2dd   : > { %v814_v18 = vpop.xlane.xlu0 %813 }
 0x2de   : > { %v815_v19 = vsub.f32 %v808_v15, %v814_v18 }
 0x2e0   : > { %v816_v20 = vmul.f32 1.442695, %v815_v19 }
 0x2e1   : > { %v1232_v30 = vpop.permute.xlu0 %1231 }
 0x2e2   : > { %4418 = vpow2.f32 %v816_v20 }
 0x2ec   : > { %v4419_v21 = vpop.eup %4418 }
 0x2ed   : > { %v818_v22 = vsel %vm736_vm3, %v4419_v21, 0.0 }
 0x2ee   : > { %819 = vadd.xlane.f32.xlu1 %v818_v22  ;;  %v3796_v22 = vld [vmem:[%s5064_s21] ss:$0 sm:$0xff]  ;;  %s5067_s21 = sld [smem:[#allocation10_spill]] (!%p3973_p5) }
 0x2ff   : > { %1064 = vrot.lane.b32.xlu1 %v732_v12, %s4458_s1  ;;  %s5068_s1 = sld [smem:[#allocation11_spill]] (!%p3973_p5) }
 0x303   : > { %1229 = vrot.lane.b32.xlu1 %v732_v12, %s4459_s3 }
 0x37b   : > { %v820_v26 = vpop.xlane.xlu1 %819 }
 0x37c   : > { %4420 = vrcp.f32 %v820_v26 }
 0x37f   : > { %v1065_v29 = vpop.permute.xlu1 %1064 }
 0x383   : > { %v1230_v31 = vpop.permute.xlu1 %1229 }
 0x386   : > { %v4421_v27 = vpop.eup %4420 }
 0x387   : > { %v822_v28 = vmul.f32 %v4421_v27, %v4419_v21 }
 0x389   : > { %4201 = vmatmul.mubr.msk.f32.vlgmr.msra.gmra.mrb[2].mxu1 %vm736_vm3, %v822_v28 }
 0x38a   : > { %4204 = vmatpush3.xpose.msk.msra.mxu1 %vm736_vm3, %v902_v23  ;;  %4205 = vmatprep.mubr.msk.f32.mxu1 %vm4451_vm1, %v4450_v2 }
 0x38b   : > { %4213 = vmatprep.subr.mxu1 %v4450_v2 }
 0x38d   : > { %4206 = vmatmul.mubr.msk.f32.vlgmr.msra.gmra.mrb[4].mxu1 %vm736_vm3, %v900_v24 }
 0x38e   : > { %4214 = vmatpush3.xpose.msk.msra.mxu1 %vm736_vm3, %v1067_v25  ;;  %4215 = vmatprep.mubr.msk.f32.mxu1 %vm4451_vm1, %v4450_v2 }
 0x38f   : > { %4223 = vmatprep.subr.mxu1 %v4450_v2 }
 0x391   : > { %4216 = vmatmul.mubr.msk.f32.vlgmr.msra.gmra.mrb[6].mxu1 %vm736_vm3, %v1065_v29 }
 0x392   : > { %4224 = vmatpush3.xpose.msk.msra.mxu1 %vm736_vm3, %v1232_v30  ;;  %4225 = vmatprep.mubr.msk.f32.mxu1 %vm4451_vm1, %v4450_v2 }
 0x393   : > { %4233 = vmatprep.subr.bf16.mxu1 %v4450_v2 }
 0x395   : > { %4226 = vmatmul.mubr.msk.f32.vlgmr.msra.gmra.mrb[8].mxu1 %vm736_vm3, %v1230_v31 }
 0x396   : > { %4237 = vmatprep.mubr.msk.bf16.mxu1 %vm4451_vm1, %v4450_v2 }
 0x45c   : > { %v4676_v32 = vpop.f32.mrb[2].mxu1 }
 0x45d   : > { %v4202_v33 = vpop.f32.mrb[3].mxu1 }
 0x460   : > { %v973_v34 = vpop.f32.mrb[4].mxu1 }
 0x461   : > { %v4207_v35 = vpop.f32.mrb[5].mxu1  ;;  %v977_v36 = vsel %vm736_vm3, %v973_v34, -inf }
 0x462   : > { %978 = vmax.xlane.f32.xlu1 %v977_v36  ;;  %v1510_v35 = vld [vmem:[%s4585_s0] sm:$0xff] }
 0x463   : > { %v1518_v36 = vld [vmem:[%s4585_s0 + $0x40] sm:$0xff] }
 0x464   : > { %v1138_v37 = vpop.f32.mrb[6].mxu1 }
 0x465   : > { %v4217_v38 = vpop.f32.mrb[7].mxu1  ;;  %v1142_v39 = vsel %vm736_vm3, %v1138_v37, -inf }
 0x466   : > { %1143 = vmax.xlane.f32.xlu0 %v1142_v39  ;;  %v3803_v38 = vcombine.high %v1510_v35, %v1518_v36  ;;  %v1519_v39 = vld [vmem:[%s4585_s0 + $0x48] sm:$0xff] }
 0x468   : > { %v1303_v40 = vpop.f32.mrb[8].mxu1 }
 0x469   : > { %v4227_v41 = vpop.f32.mrb[9].mxu1  ;;  %v1307_v42 = vsel %vm736_vm3, %v1303_v40, -inf }
 0x46a   : > { %1308 = vmax.xlane.f32.xlu1 %v1307_v42  ;;  %v1526_v42 = vld [vmem:[%s4585_s0 + $0x80] sm:$0xff] }
 0x47b   : > { %988 = vrot.lane.b32.xlu1 %v4642_v8, %s4460_s26 }
 0x4ef   : > { %v979_v43 = vpop.xlane.xlu1 %978 }
 0x4f0   : > { %v980_v44 = vsub.f32 %v973_v34, %v979_v43  ;;  %v1534_v43 = vld [vmem:[%s4585_s0 + $0xc0] sm:$0xff] }
 0x4f2   : > { %v981_v45 = vmul.f32 1.442695, %v980_v44  ;;  %v1527_v44 = vld [vmem:[%s4585_s0 + $0x88] sm:$0xff] }
 0x4f3   : > { %v1144_v46 = vpop.xlane.xlu0 %1143 }
 0x4f4   : > { %4422 = vpow2.f32 %v981_v45  ;;  %v1145_v47 = vsub.f32 %v1138_v37, %v1144_v46  ;;  %v1511_v37 = vld [vmem:[%s4585_s0 + $0x8] sm:$0xff]  ;;  %v3819_v45 = vcombine.high %v1526_v42, %v1534_v43 }
 0x4f5   : > { %v3805_v41 = vcombine.high %v1511_v37, %v1519_v39  ;;  %v1535_v46 = vld [vmem:[%s4585_s0 + $0xc8] sm:$0xff] }
 0x4f6   : > { %v1146_v48 = vmul.f32 1.442695, %v1145_v47  ;;  %v3818_v47 = vcombine.low %v1526_v42, %v1534_v43 }
 0x4f7   : > { %v1309_v49 = vpop.xlane.xlu1 %1308 }
 0x4f8   : > { %4424 = vpow2.f32 %v1146_v48  ;;  %v1310_v50 = vsub.f32 %v1303_v40, %v1309_v49  ;;  %v3804_v40 = vcombine.low %v1511_v37, %v1519_v39  ;;  %v3820_v48 = vcombine.low %v1527_v44, %v1535_v46  ;;  %v1540_v37 = vld [vmem:[%s4585_s0 + $0xf0] sm:$0xff]  ;;  %v1541_v39 = vld [vmem:[%s4585_s0 + $0xf8] sm:$0xff] }
 0x4f9   : > { %v3821_v49 = vcombine.high %v1527_v44, %v1535_v46  ;;  %v4291_v46 = vld [vmem:[%s4600_s16 + $0xc0] sm:$0xff]  }
 0x4fa   : > { %v1311_v51 = vmul.f32 1.442695, %v1310_v50  ;;  %v1512_v50 = vld [vmem:[%s4585_s0 + $0x10] sm:$0xff] }
 0x4fb   : > { %v989_v52 = vpop.permute.xlu1 %988 }
 0x4fc   : > { %4426 = vpow2.f32 %v1311_v51  ;;  %4209 = vmatpush3.msra.mxu0 %v989_v52  ;;  %v1520_v51 = vld [vmem:[%s4585_s0 + $0x50] sm:$0xff]  ;;  %v1513_v52 = vld [vmem:[%s4585_s0 + $0x18] sm:$0xff] }
 0x4fd   : > { %4218 = vmatprep.subr.mxu0 %v4450_v2 }
 0x4fe   : > { %v4423_v53 = vpop.eup %4422 }
 0x4ff   : > { %v983_v54 = vsel %vm736_vm3, %v4423_v53, 0.0 }
 0x500   : > { %984 = vadd.xlane.f32.xlu1 %v983_v54  ;;  %v3807_v54 = vcombine.high %v1512_v50, %v1520_v51 }
 0x502   : > { %v4425_v55 = vpop.eup %4424 }
 0x503   : > { %v1148_v56 = vsel %vm736_vm3, %v4425_v55, 0.0 }
 0x504   : > { %1149 = vadd.xlane.f32.xlu1 %v1148_v56  ;;  %v3806_v56 = vcombine.low %v1512_v50, %v1520_v51  ;;  %v4295_v50 = vld [vmem:[%s4600_s16 + $0xc8] sm:$0xff]  }
 0x505   : > { %v4296_v51 = vld [vmem:[%s4600_s16 + $0x8] sm:$0xff]  }
 0x506   : > { %v4427_v57 = vpop.eup %4426 }
 0x507   : > { %v1313_v58 = vsel %vm736_vm3, %v4427_v57, 0.0 }
 0x508   : > { %1314 = vadd.xlane.f32.xlu0 %v1313_v58 }
 0x515   : > { %1318 = vrot.lane.b32.xlu1 %v4642_v8, %s4461_s6 }
 0x51e   : > { %1153 = vrot.lane.b32.xlu0 %v4642_v8, %s4462_s18  ;;  %v4288_v8 = vld [vmem:[%s4575_s30] sm:$0xff]   ;;  %s5065_s18 = sld [smem:[#allocation9_spill]] (!%p3973_p5) }
 0x51f   : > { %4234 = vmatpush3.bf16.msra.mxu1 %v4288_v8  ;;  %v1537_v8 = vld [vmem:[%s4585_s0 + $0xd8] sm:$0xff] }
 0x520   : > { %4235 = vmatprep.subr.bf16.mxu1 %v4450_v2 }
 0x523   : > { %4236 = vmatpush3.bf16.msra.mxu1 %v4289_v9 }
 0x524   : > { %1830 = vmatprep.subr.bf16.mxu1 %v3805_v41 }
 0x58d   : > { %v985_v59 = vpop.xlane.xlu1 %984 }
 0x58e   : > { %4428 = vrcp.f32 %v985_v59 }
 0x591   : > { %v1150_v60 = vpop.xlane.xlu1 %1149 }
 0x592   : > { %4430 = vrcp.f32 %v1150_v60 }
 0x595   : > { %v1315_v61 = vpop.xlane.xlu0 %1314  ;;  %v1319_v5 = vpop.permute.xlu1 %1318 }
 0x596   : > { %4432 = vrcp.f32 %v1315_v61 }
 0x598   : > { %v4429_v62 = vpop.eup %4428 }
 0x599   : > { %v987_v63 = vmul.f32 %v4429_v62, %v4423_v53  ;;  %v1154_v0 = vpop.permute.xlu0 %1153  ;;  %v4466_v53 = vmov 0  }
 0x59b   : > { %4211 = vmatmul.mubr.msk.f32.vlgmr.msra.gmra.mrb[4].mxu0 %vm736_vm3, %v987_v63  ;;  %v3800_v63 = vld [vmem:[%s645_s13] ss:$0 sm:$0xff] }
 0x59c   : > { %v4431_v1 = vpop.eup %4430  ;;  %4219 = vmatpush3.msra.mxu0 %v1154_v0  ;;  %4220 = vmatprep.mubr.msk.f32.mxu0 %vm4451_vm1, %v4450_v2 }
 0x59d   : > { %v1152_v3 = vmul.f32 %v4431_v1, %v4425_v55  ;;  %4228 = vmatprep.subr.mxu0 %v4450_v2  ;;  %v1521_v55 = vld [vmem:[%s4585_s0 + $0x58] sm:$0xff]  ;;  %v3801_v1 = vld [vmem:[%s648_s22] ss:$0 sm:$0xff] }
 0x59e   : > { %v3809_v58 = vcombine.high %v1513_v52, %v1521_v55 }
 0x59f   : > { %4221 = vmatmul.mubr.msk.f32.vlgmr.msra.gmra.mrb[6].mxu0 %vm736_vm3, %v1152_v3 }
 0x5a0   : > { %v4433_v6 = vpop.eup %4432  ;;  %4229 = vmatpush3.msra.mxu0 %v1319_v5  ;;  %4230 = vmatprep.mubr.msk.f32.mxu0 %vm4451_vm1, %v4450_v2  ;;  %v1528_v5 = vld [vmem:[%s4585_s0 + $0x90] sm:$0xff] }
 0x5a1   : > { %v1317_v7 = vmul.f32 %v4433_v6, %v4427_v57  ;;  %1789 = vmatprep.subr.bf16.mxu0 %v3803_v38  ;;  %v3808_v57 = vcombine.low %v1513_v52, %v1521_v55  ;;  %v1536_v6 = vld [vmem:[%s4585_s0 + $0xd0] sm:$0xff]  ;;  %v1533_v38 = vld [vmem:[%s4585_s0 + $0xb8] sm:$0xff]  ;;  %v4297_v52 = vld [vmem:[%s4600_s16 + $0x88] sm:$0xff]  }
 0x5a2   : > { %v3833_v42 = vcombine.high %v1533_v38, %v1541_v39  ;;  %v3832_v44 = vcombine.low %v1533_v38, %v1541_v39  ;;  %v4300_v55 = vld [vmem:[%s4600_s16 + $0x10] sm:$0xff]  }
 0x5a3   : > { %4231 = vmatmul.mubr.msk.f32.vlgmr.msra.gmra.mrb[8].mxu0 %vm736_vm3, %v1317_v7  ;;  %v1529_v7 = vld [vmem:[%s4585_s0 + $0x98] sm:$0xff] }
 0x5a4   : > { %1821 = vmatprep.mubr.bf16.mxu0 %v4466_v53 }
 0x66e   : > { %v1060_v10 = vpop.f32.mrb[4].mxu0 }
 0x66f   : > { %1395 = vrot.lane.b32.xlu1 %v1060_v10, %s4463_s27  ;;  %v4212_v11 = vpop.f32.mrb[5].mxu0  ;;  %s5066_s27 = smov (!%p3973_p5), %s5065_s18 }
 0x670   : > { %v3823_v11 = vcombine.high %v1528_v5, %v1536_v6 }
 0x672   : > { %v1225_v12 = vpop.f32.mrb[6].mxu0 }
 0x673   : > { %1399 = vrot.lane.b32.xlu0 %v1225_v12, %s4464_s17  ;;  %v4222_v13 = vpop.f32.mrb[7].mxu0  ;;  %v3825_v12 = vcombine.high %v1529_v7, %v1537_v8 }
 0x674   : > { %v1514_v13 = vld [vmem:[%s4585_s0 + $0x20] sm:$0xff] }
 0x676   : > { %v1390_v14 = vpop.f32.mrb[8].mxu0 }
 0x677   : > { %1403 = vrot.lane.b32.xlu1 %v1390_v14, %s4465_s14  ;;  %v4232_v15 = vpop.f32.mrb[9].mxu0  ;;  %v1522_v14 = vld [vmem:[%s4585_s0 + $0x60] sm:$0xff] }
 0x678   : > { %v1515_v15 = vld [vmem:[%s4585_s0 + $0x28] sm:$0xff] }
 0x6e1   : > { %v1396_v16 = vpop.permute.xlu1 %1395 }
 0x6e2   : > { %v1406_v2 = vsel %vm736_vm3, %v4676_v32, %v1396_v16  ;;  %v1523_v16 = vld [vmem:[%s4585_s0 + $0x68] sm:$0xff] }
 0x6e5   : > { %v1400_v17 = vpop.permute.xlu0 %1399 }
 0x6e6   : > { %v1408_v18 = vsel %vm1407_vm4, %v1406_v2, %v1400_v17  ;;  %v3822_v17 = vcombine.low %v1528_v5, %v1536_v6  ;;  %v3824_v2 = vcombine.low %v1529_v7, %v1537_v8  ;;  %v4312_v5 = vld [vmem:[%s4600_s16 + $0x28] sm:$0xff]   ;;  %v4314_v7 = vld [vmem:[%s4600_s16 + $0x70] sm:$0xff]  }
 0x6e7   : > { %v4313_v6 = vld [vmem:[%s4600_s16 + $0xa8] sm:$0xff]   ;;  %v4315_v8 = vld [vmem:[%s4600_s16 + $0xf0] sm:$0xff]  }
 0x6e9   : > { %v1404_v19 = vpop.permute.xlu1 %1403 }
 0x6ea   : > { %v1410_v20 = vsel %vm1409_vm5, %v1408_v18, %v1404_v19  ;;  %v3811_v18 = vcombine.high %v1514_v13, %v1522_v14  ;;  %v3813_v19 = vcombine.high %v1515_v15, %v1523_v16 }
 0x6eb   : > { %v1411_v21 = vpack.c.bf16 %v1410_v20, %v1410_v20  ;;  %v1530_v20 = vld [vmem:[%s4585_s0 + $0xa0] sm:$0xff] }
 0x6ed   : > { %4238 = vmatmul.mubr.msk.bf16.vlgmr.msra.gmra.mrb[12].mxu1 %vm688_vm2, %v1411_v21  ;;  %v1538_v21 = vld [vmem:[%s4585_s0 + $0xe0] sm:$0xff] }
 0x6ee   : > { %1831 = vmatpush1.bf16.msra.mxu1 %v3804_v40  ;;  %1862 = vmatprep.mubr.bf16.mxu1 %v4466_v53 }
 0x6ef   : > { %1832 = vmatprep.subr.bf16.mxu1 %v3821_v49  ;;  %v4294_v49 = vld [vmem:[%s4600_s16 + $0x48] sm:$0xff]  }
 0x6f2   : > { %1833 = vmatpush1.bf16.msra.mxu1 %v3820_v48  ;;  %v4293_v48 = vld [vmem:[%s4600_s16 + $0x80] sm:$0xff]  }
 0x6f3   : > { %1912 = vmatprep.subr.bf16.mxu1 %v3809_v58  ;;  %v4303_v58 = vld [vmem:[%s4600_s16 + $0xd8] sm:$0xff]  }
 0x7c0   : > { %v1472_v23 = vpop.f32.mrb[12].mxu1 }
 0x7c1   : > { %v1473_v24 = vadd.f32 %v3796_v22, %v1472_v23  ;;  %v4239_v25 = vpop.f32.mrb[13].mxu1  ;;  %v1531_v22 = vld [vmem:[%s4585_s0 + $0xa8] sm:$0xff] }
 0x7c2   : > { %v1475_v26 = vpop.f32.mrb[14].mxu1  ;;  %v1539_v23 = vld [vmem:[%s4585_s0 + $0xe8] sm:$0xff]  ;;  %v3812_v25 = vcombine.low %v1515_v15, %v1523_v16  ;;  %v4321_v15 = vld [vmem:[%s4600_s16 + $0xb8] sm:$0xff]   ;;  %v4322_v16 = vld [vmem:[%s4600_s16 + $0x140] sm:$0xff]  }
 0x7c3   : > { %v4240_v27 = vpop.f32.mrb[15].mxu1  ;;  %v1478_v28 = vadd.f32 %v1473_v24, %v4626_v4  ;;  %v3802_v4 = vcombine.low %v1510_v35, %v1518_v36  ;;  %v3810_v24 = vcombine.low %v1514_v13, %v1522_v14  ;;  %v3827_v26 = vcombine.high %v1530_v20, %v1538_v21  ;;  %v1532_v36 = vld [vmem:[%s4585_s0 + $0xb0] sm:$0xff]  ;;  %v4319_v13 = vld [vmem:[%s4600_s16 + $0xf8] sm:$0xff]  }
 0x7c4   : > { %v3829_v27 = vcombine.high %v1531_v22, %v1539_v23  ;;  %v3831_v41 = vcombine.high %v1532_v36, %v1540_v37  ;;  %v3830_v43 = vcombine.low %v1532_v36, %v1540_v37  ;;  %v4320_v14 = vld [vmem:[%s4600_s16 + $0x38] sm:$0xff]  }
 0x7c5   : > { %v1481_v29 = vsel %vm688_vm2, %v1478_v28, 0.0  ;;  %1790 = vmatpush1.bf16.msra.mxu0 %v3802_v4 }
 0x7c6   : > { %1482 = vadd.xlane.f32.xlu0 %v1481_v29  ;;  %1791 = vmatprep.subr.bf16.mxu0 %v3819_v45  ;;  %v1524_v29 = vld [vmem:[%s4585_s0 + $0x70] sm:$0xff]  ;;  %v4290_v45 = vld [vmem:[%s4600_s16 + $0x40] sm:$0xff]  }
 0x7c9   : > { %1792 = vmatpush1.bf16.msra.mxu0 %v3818_v47  ;;  %v4292_v47 = vld [vmem:[%s4600_s16] sm:$0xff]  }
 0x7ca   : > { %1871 = vmatprep.subr.bf16.mxu0 %v3807_v54  ;;  %v4299_v54 = vld [vmem:[%s4600_s16 + $0xd0] sm:$0xff]  }
 0x853   : > { %v1483_v30 = vpop.xlane.xlu0 %1482 }
 0x854   : > { %v1485_v31 = vmul.f32 0.03125, %v1483_v30  ;;  %v1517_v30 = vld [vmem:[%s4585_s0 + $0x38] sm:$0xff] }
 0x856   : > { %v1486_v32 = vsub.f32 %v1478_v28, %v1485_v31  ;;  %v1516_v28 = vld [vmem:[%s4585_s0 + $0x30] sm:$0xff]  ;;  %v1525_v31 = vld [vmem:[%s4585_s0 + $0x78] sm:$0xff] }
 0x857   : > { %v3817_v35 = vcombine.high %v1517_v30, %v1525_v31  ;;  %v3814_v4 = vcombine.low %v1516_v28, %v1524_v29  ;;  %v3816_v40 = vcombine.low %v1517_v30, %v1525_v31 }
 0x858   : > { %v1487_v33 = vmul.f32 %v1486_v32, %v1486_v32 }
 0x85a   : > { %v1488_v34 = vsel %vm688_vm2, %v1487_v33, 0.0  ;;  %v3828_v33 = vcombine.low %v1531_v22, %v1539_v23 }
 0x85b   : > { %1489 = vadd.xlane.f32.xlu1 %v1488_v34  ;;  %v3815_v34 = vcombine.high %v1516_v28, %v1524_v29 }
 0x8e8   : > { %v1490_v59 = vpop.xlane.xlu1 %1489 }
 0x8e9   : > { %v1491_v60 = vmul.f32 0.03125, %v1490_v59  ;;  %v4304_v59 = vld [vmem:[%s4600_s16 + $0x18] sm:$0xff]  }
 0x8eb   : > { %v1492_v61 = vadd.f32 1e-05, %v1491_v60  ;;  %v4305_v60 = vld [vmem:[%s4600_s16 + $0x98] sm:$0xff]  }
 0x8ed   : > { %4434 = vrsqrt.f32 %v1492_v61  ;;  %v4306_v61 = vld [vmem:[%s4600_s16 + $0x60] sm:$0xff]  }
 0x8f7   : > { %v4435_v62 = vpop.eup %4434 }
 0x8f8   : > { %v1494_v0 = vmul.f32 %v4435_v62, %v1486_v32  ;;  %v3826_v32 = vcombine.low %v1530_v20, %v1538_v21  ;;  %v4307_v62 = vld [vmem:[%s4600_s16 + $0xe0] sm:$0xff]   ;;  %v4820_v20 = vld [vmem:[%s4590_s25 + $0x8] sm:$0xff] }
 0x8fa   : > { %v1501_v3 = vmul.f32 %v3800_v63, %v1494_v0  ;;  %v4308_v63 = vld [vmem:[%s4600_s16 + $0x20] sm:$0xff]  }
 0x8fb   : > { %v4309_v0 = vld [vmem:[%s4600_s16 + $0xa0] sm:$0xff]  }
 0x8fc   : > { %v4738_v9 = vadd.f32 %v3801_v1, %v1501_v3  ;;  %v4310_v1 = vld [vmem:[%s4600_s16 + $0x68] sm:$0xff]  }
 0x8fd   : > { %v4311_v3 = vld [vmem:[%s4600_s16 + $0xe8] sm:$0xff]  }
 0x8fe   : > { %v4742_v10 = vpack.c.bf16 %v4738_v9, %v4738_v9 }
 0x900   : > { %3834 = vmatmul.mubr.msk.bf16.vlgmr.msra.gmra.mrb[12].mxu0 %vm688_vm2, %v4742_v10  ;;  %3835 = vmatmul.mubr.msk.bf16.vlgmr.msra.gmra.mrb[16].mxu1 %vm688_vm2, %v4742_v10 }
 0x901   : > { %1872 = vmatpush1.bf16.msra.mxu0 %v3806_v56  ;;  %1913 = vmatpush1.bf16.msra.mxu1 %v3808_v57  ;;  %v4301_v56 = vld [vmem:[%s4600_s16 + $0x90] sm:$0xff]   ;;  %v4302_v57 = vld [vmem:[%s4600_s16 + $0x58] sm:$0xff]  }
 0x902   : > { %1873 = vmatprep.subr.bf16.mxu0 %v3823_v11  ;;  %1914 = vmatprep.subr.bf16.mxu1 %v3825_v12  ;;  %v4317_v11 = vld [vmem:[%s4600_s16 + $0xb0] sm:$0xff]   ;;  %v4318_v12 = vld [vmem:[%s4600_s16 + $0x78] sm:$0xff]  }
 0x903   : > { %1903 = vmatprep.mubr.bf16.mxu0 %v4466_v53  ;;  %1944 = vmatprep.mubr.bf16.mxu1 %v4466_v53 }
 0x905   : > { %1874 = vmatpush1.bf16.msra.mxu0 %v3822_v17  ;;  %1915 = vmatpush1.bf16.msra.mxu1 %v3824_v2  ;;  %v4323_v17 = vld [vmem:[%s4600_s16 + $0x1c0] sm:$0xff]   ;;  %v1546_v2 = vlaneseq }
 0x906   : > { %1953 = vmatprep.subr.bf16.mxu0 %v3811_v18  ;;  %1994 = vmatprep.subr.bf16.mxu1 %v3813_v19 }
 0x907   : > { %v4816_v18 = vshrl.u32 %v1546_v2, 7  ;;  %v4333_v2 = vld [vmem:[%s4600_s16 + $0x190] sm:$0xff]  }
 0x908   : > { %3836 = vmatmul.mubr.msk.bf16.vlgmr.msra.gmra.mrb[16].mxu0 %vm688_vm2, %v4742_v10  ;;  %3837 = vmatmul.mubr.msk.bf16.vlgmr.msra.gmra.mrb[20].mxu1 %vm688_vm2, %v4742_v10 }
 0x909   : > { %1954 = vmatpush1.bf16.msra.mxu0 %v3810_v24  ;;  %1995 = vmatpush1.bf16.msra.mxu1 %v3812_v25  ;;  %v1572_v19 = vsub.s32 6, %v4816_v18  ;;  %v1548_v22 = vsub.s32 0, %v4816_v18  ;;  %v1556_v23 = vsub.s32 2, %v4816_v18  ;;  %v4830_v24 = vld [vmem:[%s4590_s25] sm:$0xff]  ;;  %v1552_v25 = vsub.s32 1, %v4816_v18 }
 0x90a   : > { %1955 = vmatprep.subr.bf16.mxu0 %v3827_v26  ;;  %1996 = vmatprep.subr.bf16.mxu1 %v3829_v27  ;;  %v1560_v26 = vsub.s32 3, %v4816_v18 }
 0x90b   : > { %1985 = vmatprep.mubr.bf16.mxu0 %v4466_v53  ;;  %2026 = vmatprep.mubr.bf16.mxu1 %v4466_v53  ;;  %v4825_v21 = vrot.slane %v4820_v20, %v1572_v19  ;;  %v1549_v27 = vrot.slane %v4830_v24, %v1548_v22  ;;  %v1557_v28 = vrot.slane %v4830_v24, %v1556_v23 }
 0x90c   : > { %v1553_v29 = vrot.slane %v4830_v24, %v1552_v25  ;;  %v1561_v30 = vrot.slane %v4830_v24, %v1560_v26 }
 0x90d   : > { %1956 = vmatpush1.bf16.msra.mxu0 %v3826_v32  ;;  %1997 = vmatpush1.bf16.msra.mxu1 %v3828_v33 }
 0x90e   : > { %2035 = vmatprep.subr.bf16.mxu0 %v3815_v34  ;;  %2076 = vmatprep.subr.bf16.mxu1 %v3817_v35 }
 0x910   : > { %3838 = vmatmul.mubr.msk.bf16.vlgmr.msra.gmra.mrb[20].mxu0 %vm688_vm2, %v4742_v10  ;;  %3839 = vmatmul.mubr.msk.bf16.vlgmr.msra.gmra.mrb[24].mxu1 %vm688_vm2, %v4742_v10 }
 0x911   : > { %2036 = vmatpush1.bf16.msra.mxu0 %v3814_v4  ;;  %2077 = vmatpush1.bf16.msra.mxu1 %v3816_v40  ;;  %v1568_v40 = vsub.s32 5, %v4816_v18 }
 0x912   : > { %2037 = vmatprep.subr.bf16.mxu0 %v3831_v41  ;;  %2078 = vmatprep.subr.bf16.mxu1 %v3833_v42  ;;  %v1576_v41 = vsub.s32 7, %v4816_v18 }
 0x913   : > { %2067 = vmatprep.mubr.bf16.mxu0 %v4466_v53  ;;  %2108 = vmatprep.mubr.bf16.mxu1 %v4466_v53  ;;  %v4298_v53 = vld [vmem:[%s4600_s16 + $0x50] sm:$0xff]  }
 0x915   : > { %2038 = vmatpush1.bf16.msra.mxu0 %v3830_v43  ;;  %2079 = vmatpush1.bf16.msra.mxu1 %v3832_v44 }
 0x916   : > { %4004 = vmatprep.subr.bf16.mxu0 %v4290_v45  ;;  %4026 = vmatprep.subr.bf16.mxu1 %v4291_v46 }
 0x918   : > { %3840 = vmatmul.mubr.msk.bf16.vlgmr.msra.gmra.mrb[24].mxu0 %vm688_vm2, %v4742_v10  ;;  %3841 = vmatmul.mubr.msk.bf16.vlgmr.msra.gmra.mrb[28].mxu1 %vm688_vm2, %v4742_v10  ;;  %v4316_v10 = vld [vmem:[%s4600_s16 + $0x30] sm:$0xff]  }
 0x919   : > { %4005 = vmatpush3.bf16.msra.mxu0 %v4292_v47  ;;  %4027 = vmatpush3.bf16.msra.mxu1 %v4293_v48 }
 0x91a   : > { %4006 = vmatprep.subr.bf16.mxu0 %v4294_v49  ;;  %4028 = vmatprep.subr.bf16.mxu1 %v4295_v50  ;;  %v1569_v50 = vrot.slane %v4830_v24, %v1568_v40 }
 0x91d   : > { %4007 = vmatpush3.bf16.msra.mxu0 %v4296_v51  ;;  %4029 = vmatpush3.bf16.msra.mxu1 %v4297_v52  ;;  %v1577_v51 = vrot.slane %v4830_v24, %v1576_v41  ;;  %v4324_v52 = vld [vmem:[%s4600_s16 + $0x100] sm:$0xff]  }
 0x91e   : > { %4008 = vmatprep.subr.bf16.mxu0 %v4298_v53  ;;  %4030 = vmatprep.subr.bf16.mxu1 %v4299_v54  ;;  %v4325_v53 = vld [vmem:[%s4600_s16 + $0x180] sm:$0xff]  }
 0x921   : > { %4009 = vmatpush3.bf16.msra.mxu0 %v4300_v55  ;;  %4031 = vmatpush3.bf16.msra.mxu1 %v4301_v56  ;;  %v4326_v56 = vld [vmem:[%s4600_s16 + $0x148] sm:$0xff]  }
 0x922   : > { %4010 = vmatprep.subr.bf16.mxu0 %v4302_v57  ;;  %4032 = vmatprep.subr.bf16.mxu1 %v4303_v58  ;;  %v4327_v57 = vld [vmem:[%s4600_s16 + $0x1c8] sm:$0xff]  }
 0x925   : > { %4011 = vmatpush3.bf16.msra.mxu0 %v4304_v59  ;;  %4033 = vmatpush3.bf16.msra.mxu1 %v4305_v60 }
 0x926   : > { %4012 = vmatprep.subr.bf16.mxu0 %v4306_v61  ;;  %4034 = vmatprep.subr.bf16.mxu1 %v4307_v62 }
 0x929   : > { %4013 = vmatpush3.bf16.msra.mxu0 %v4308_v63  ;;  %4035 = vmatpush3.bf16.msra.mxu1 %v4309_v0 }
 0x92a   : > { %4014 = vmatprep.subr.bf16.mxu0 %v4310_v1  ;;  %4036 = vmatprep.subr.bf16.mxu1 %v4311_v3  ;;  %v4328_v3 = vld [vmem:[%s4600_s16 + $0x108] sm:$0xff]  }
 0x92d   : > { %4015 = vmatpush3.bf16.msra.mxu0 %v4312_v5  ;;  %4037 = vmatpush3.bf16.msra.mxu1 %v4313_v6  ;;  %v4329_v5 = vld [vmem:[%s4600_s16 + $0x188] sm:$0xff]  }
 0x92e   : > { %4016 = vmatprep.subr.bf16.mxu0 %v4314_v7  ;;  %4038 = vmatprep.subr.bf16.mxu1 %v4315_v8  ;;  %v4330_v8 = vld [vmem:[%s4600_s16 + $0x150] sm:$0xff]  }
 0x931   : > { %4017 = vmatpush3.bf16.msra.mxu0 %v4316_v10  ;;  %4039 = vmatpush3.bf16.msra.mxu1 %v4317_v11  ;;  %v4331_v10 = vld [vmem:[%s4600_s16 + $0x1d0] sm:$0xff]  }
 0x932   : > { %4018 = vmatprep.subr.bf16.mxu0 %v4318_v12  ;;  %4040 = vmatprep.subr.bf16.mxu1 %v4319_v13  ;;  %v1581_v13 = vrot.slane %v4820_v20, %v1548_v22 }
 0x935   : > { %4019 = vmatpush3.bf16.msra.mxu0 %v4320_v14  ;;  %4041 = vmatpush3.bf16.msra.mxu1 %v4321_v15  ;;  %v1589_v14 = vrot.slane %v4820_v20, %v1556_v23 }
 0x936   : > { %4048 = vmatprep.subr.bf16.mxu0 %v4322_v16  ;;  %4070 = vmatprep.subr.bf16.mxu1 %v4323_v17  ;;  %v4332_v17 = vld [vmem:[%s4600_s16 + $0x110] sm:$0xff]  }
 0x9d3   : > { %v1823_v31 = vpop.f32.mrb[12].mxu0  ;;  %v1864_v32 = vpop.f32.mrb[16].mxu1 }
 0x9d4   : > { %v1824_v33 = vadd.f32 %v1823_v31, %v1549_v27  ;;  %v1865_v34 = vadd.f32 %v1864_v32, %v1557_v28  ;;  %v1825_v35 = vpop.f32.mrb[13].mxu0  ;;  %v1866_v36 = vpop.f32.mrb[17].mxu1  ;;  %v4334_v27 = vld [vmem:[%s4600_s16 + $0x158] sm:$0xff]  }
 0x9d5   : > { %v1826_v37 = vadd.f32 %v1825_v35, %v1553_v29  ;;  %v1867_v38 = vadd.f32 %v1866_v36, %v1561_v30  ;;  %v1827_v39 = vpop.f32.mrb[14].mxu0  ;;  %v1868_v4 = vpop.f32.mrb[18].mxu1  ;;  %v4335_v28 = vld [vmem:[%s4600_s16 + $0x1d8] sm:$0xff]  }
 0x9d6   : > { %v2117_v42 = vmax.f32 %v1824_v33, 0.0  ;;  %v2119_v43 = vmax.f32 %v1865_v34, 0.0  ;;  %v1828_v44 = vpop.f32.mrb[15].mxu0  ;;  %v1869_v45 = vpop.f32.mrb[19].mxu1  ;;  %v4336_v35 = vld [vmem:[%s4600_s16 + $0x118] sm:$0xff]   ;;  %v4338_v4 = vld [vmem:[%s4600_s16 + $0x160] sm:$0xff]  }
 0x9d7   : > { %v2118_v46 = vmax.f32 %v1826_v37, 0.0  ;;  %v2120_v47 = vmax.f32 %v1867_v38, 0.0  ;;  %v4337_v36 = vld [vmem:[%s4600_s16 + $0x198] sm:$0xff]   ;;  %v1564_v37 = vsub.s32 4, %v4816_v18  ;;  %v4340_v44 = vld [vmem:[%s4600_s16 + $0x120] sm:$0xff]  }
 0x9d8   : > { %v2133_v54 = vpack.c.bf16 %v2117_v42, %v2117_v42  ;;  %v2135_v55 = vpack.c.bf16 %v2119_v43, %v2119_v43  ;;  %v4339_v42 = vld [vmem:[%s4600_s16 + $0x1e0] sm:$0xff]   ;;  %v4384_v18 = vld [vmem:[%s4600_s16 + $0x238] sm:$0xff]  }
 0x9d9   : > { %v2134_v48 = vpack.c.bf16 %v2118_v46, %v2118_v46  ;;  %v2136_v49 = vpack.c.bf16 %v2120_v47, %v2120_v47  ;;  %v1597_v43 = vrot.slane %v4820_v20, %v1564_v37  ;;  %v4341_v45 = vld [vmem:[%s4600_s16 + $0x1a0] sm:$0xff]   ;;  %v4342_v46 = vld [vmem:[%s4600_s16 + $0x168] sm:$0xff]  }
 0x9da   : > { %v4343_v47 = vld [vmem:[%s4600_s16 + $0x1e8] sm:$0xff]  }
 0x9db   : > { %v4854_v58 = vpop.f32.mrb[16].mxu0  ;;  %v4856_v59 = vpop.f32.mrb[20].mxu1  ;;  %3212 = vmatprep.mubr.bf16.mxu0 %v2134_v48  ;;  %3252 = vmatprep.mubr.bf16.mxu1 %v2136_v49 }
 0x9dc   : > { %v1907_v60 = vpop.f32.mrb[17].mxu0  ;;  %v1948_v61 = vpop.f32.mrb[21].mxu1  ;;  %3213 = vmatmul.mubr.bf16.vlgmr.msra.gmra.mrb[28].mxu0 %v2133_v54  ;;  %3253 = vmatmul.mubr.bf16.vlgmr.msra.gmra.mrb[32].mxu1 %v2135_v55 }
 0x9dd   : > { %v1908_v62 = vadd.f32 %v1907_v60, %v1569_v50  ;;  %v1949_v63 = vadd.f32 %v1948_v61, %v1577_v51  ;;  %4049 = vmatpush3.bf16.msra.mxu0 %v4324_v52  ;;  %4071 = vmatpush3.bf16.msra.mxu1 %v4325_v53  ;;  %v1909_v0 = vpop.f32.mrb[18].mxu0  ;;  %v1950_v1 = vpop.f32.mrb[22].mxu1  ;;  %v1565_v60 = vrot.slane %v4830_v24, %v1564_v37  ;;  %v4365_v37 = vld [vmem:[%s4600_s16 + $0x290] sm:$0xff]  }
 0x9de   : > { %v1910_v6 = vpop.f32.mrb[19].mxu0  ;;  %v1951_v7 = vpop.f32.mrb[23].mxu1  ;;  %4050 = vmatprep.subr.bf16.mxu0 %v4326_v56  ;;  %4072 = vmatprep.subr.bf16.mxu1 %v4327_v57  ;;  %v4344_v56 = vld [vmem:[%s4600_s16 + $0x128] sm:$0xff]   ;;  %v4347_v0 = vld [vmem:[%s4600_s16 + $0x1f0] sm:$0xff]   ;;  %v1585_v1 = vrot.slane %v4820_v20, %v1552_v25  ;;  %v4351_v25 = vld [vmem:[%s4600_s16 + $0x1f8] sm:$0xff]  }
 0x9df   : > { %v2122_v11 = vmax.f32 %v1908_v62, 0.0  ;;  %v2124_v12 = vmax.f32 %v1949_v63, 0.0  ;;  %v4345_v57 = vld [vmem:[%s4600_s16 + $0x1a8] sm:$0xff]   ;;  %v4346_v63 = vld [vmem:[%s4600_s16 + $0x170] sm:$0xff]   ;;  %v4350_v7 = vld [vmem:[%s4600_s16 + $0x178] sm:$0xff]  }
 0x9e1   : > { %v2138_v15 = vpack.c.bf16 %v2122_v11, %v2122_v11  ;;  %v2140_v16 = vpack.c.bf16 %v2124_v12, %v2124_v12  ;;  %4051 = vmatpush3.bf16.msra.mxu0 %v4328_v3  ;;  %4073 = vmatpush3.bf16.msra.mxu1 %v4329_v5  ;;  %v1593_v3 = vrot.slane %v4820_v20, %v1560_v26  ;;  %v4352_v26 = vld [vmem:[%s4600_s16 + $0x138] sm:$0xff]  }
 0x9e2   : > { %4052 = vmatprep.subr.bf16.mxu0 %v4330_v8  ;;  %4074 = vmatprep.subr.bf16.mxu1 %v4331_v10  ;;  %v1906_v5 = vadd.f32 %v4854_v58, %v1565_v60  ;;  %v4353_v11 = vld [vmem:[%s4600_s16 + $0x1b8] sm:$0xff]   ;;  %v4354_v58 = vld [vmem:[%s4600_s16 + $0x240] sm:$0xff]   ;;  %v1609_v60 = vrot.slane %v4820_v20, %v1576_v41 }
 0x9e3   : > { %v1987_v29 = vpop.f32.mrb[20].mxu0  ;;  %v2028_v30 = vpop.f32.mrb[24].mxu1  ;;  %3292 = vmatprep.mubr.bf16.mxu0 %v2138_v15  ;;  %3332 = vmatprep.mubr.bf16.mxu1 %v2140_v16  ;;  %v4356_v16 = vld [vmem:[%s4600_s16 + $0x200] sm:$0xff]   ;;  %v4385_v41 = vld [vmem:[%s4600_s16 + $0x2b8] sm:$0xff]  }
 0x9e4   : > { %v4868_v22 = vadd.f32 %v1987_v29, %v1581_v13  ;;  %v4870_v23 = vadd.f32 %v2028_v30, %v1589_v14  ;;  %v1989_v31 = vpop.f32.mrb[21].mxu0  ;;  %v2030_v32 = vpop.f32.mrb[25].mxu1  ;;  %v2121_v12 = vmax.f32 %v1906_v5, 0.0  ;;  %v4358_v29 = vld [vmem:[%s4600_s16 + $0x248] sm:$0xff]  }
 0x9e5   : > { %4053 = vmatpush3.bf16.msra.mxu0 %v4332_v17  ;;  %4075 = vmatpush3.bf16.msra.mxu1 %v4333_v2  ;;  %v1991_v33 = vpop.f32.mrb[22].mxu0  ;;  %v2032_v34 = vpop.f32.mrb[26].mxu1  ;;  %v1990_v8 = vadd.f32 %v1989_v31, %v1585_v1  ;;  %v2031_v10 = vadd.f32 %v2030_v32, %v1593_v3  ;;  %v4359_v30 = vld [vmem:[%s4600_s16 + $0x2c8] sm:$0xff]   ;;  %v4386_v1 = vld [vmem:[%s4600_s16 + $0x340] sm:$0xff]  }
 0x9e6   : > { %v1992_v38 = vpop.f32.mrb[23].mxu0  ;;  %v2033_v39 = vpop.f32.mrb[27].mxu1  ;;  %4054 = vmatprep.subr.bf16.mxu0 %v4334_v27  ;;  %4076 = vmatprep.subr.bf16.mxu1 %v4335_v28  ;;  %v2137_v17 = vpack.c.bf16 %v2121_v12, %v2121_v12  ;;  %v4357_v27 = vld [vmem:[%s4600_s16 + $0x280] sm:$0xff]   ;;  %v4360_v32 = vld [vmem:[%s4600_s16 + $0x208] sm:$0xff]   ;;  %v4362_v34 = vld [vmem:[%s4600_s16 + $0x250] sm:$0xff]   ;;  %v2127_v3 = vmax.f32 %v4870_v23, 0.0 }
 0x9e7   : > { %v2126_v14 = vmax.f32 %v1990_v8, 0.0  ;;  %v2128_v15 = vmax.f32 %v2031_v10, 0.0  ;;  %v4361_v33 = vld [vmem:[%s4600_s16 + $0x288] sm:$0xff]   ;;  %v4366_v38 = vld [vmem:[%s4600_s16 + $0x258] sm:$0xff]   ;;  %v4395_v12 = vld [vmem:[%s4600_s16 + $0x3d0] sm:$0xff]  }
 0x9e8   : > { %v4367_v39 = vld [vmem:[%s4600_s16 + $0x2d8] sm:$0xff]   ;;  %v4391_v23 = vld [vmem:[%s4600_s16 + $0x3c8] sm:$0xff]  }
 0x9e9   : > { %4055 = vmatpush3.bf16.msra.mxu0 %v4336_v35  ;;  %4077 = vmatpush3.bf16.msra.mxu1 %v4337_v36  ;;  %v2142_v28 = vpack.c.bf16 %v2126_v14, %v2126_v14  ;;  %v2144_v31 = vpack.c.bf16 %v2128_v15, %v2128_v15  ;;  %v4363_v35 = vld [vmem:[%s4600_s16 + $0x2d0] sm:$0xff]   ;;  %v4392_v10 = vld [vmem:[%s4600_s16 + $0x308] sm:$0xff]   ;;  %v4399_v14 = vld [vmem:[%s4600_s16 + $0x3d8] sm:$0xff]  }
 0x9ea   : > { %4056 = vmatprep.subr.bf16.mxu0 %v4338_v4  ;;  %4078 = vmatprep.subr.bf16.mxu1 %v4339_v42  ;;  %v4364_v36 = vld [vmem:[%s4600_s16 + $0x210] sm:$0xff]   ;;  %v4368_v4 = vld [vmem:[%s4600_s16 + $0x218] sm:$0xff]  }
 0x9eb   : > { %v2069_v48 = vpop.f32.mrb[24].mxu0  ;;  %v2110_v49 = vpop.f32.mrb[28].mxu1  ;;  %v4369_v42 = vld [vmem:[%s4600_s16 + $0x298] sm:$0xff]  }
 0x9ec   : > { %v4882_v50 = vadd.f32 %v2069_v48, %v1597_v43  ;;  %v4885_v51 = vadd.f32 %v2110_v49, %v4825_v21  ;;  %v4887_v52 = vpop.f32.mrb[25].mxu0  ;;  %v4889_v53 = vpop.f32.mrb[29].mxu1  ;;  %v1573_v21 = vrot.slane %v4830_v24, %v1572_v19  ;;  %v4348_v19 = vld [vmem:[%s4600_s16 + $0x130] sm:$0xff]   ;;  %v4370_v43 = vld [vmem:[%s4600_s16 + $0x260] sm:$0xff]   ;;  %v4375_v48 = vld [vmem:[%s4600_s16 + $0x2e8] sm:$0xff]  }
 0x9ed   : > { %4057 = vmatpush3.bf16.msra.mxu0 %v4340_v44  ;;  %4079 = vmatpush3.bf16.msra.mxu1 %v4341_v45  ;;  %v2073_v54 = vpop.f32.mrb[26].mxu0  ;;  %v2114_v55 = vpop.f32.mrb[30].mxu1  ;;  %v4349_v24 = vld [vmem:[%s4600_s16 + $0x1b0] sm:$0xff]   ;;  %v4371_v44 = vld [vmem:[%s4600_s16 + $0x2e0] sm:$0xff]   ;;  %v4376_v49 = vld [vmem:[%s4600_s16 + $0x228] sm:$0xff]  }
 0x9ee   : > { %v2074_v61 = vpop.f32.mrb[27].mxu0  ;;  %v2115_v62 = vpop.f32.mrb[31].mxu1  ;;  %4058 = vmatprep.subr.bf16.mxu0 %v4342_v46  ;;  %4080 = vmatprep.subr.bf16.mxu1 %v4343_v47  ;;  %v1947_v6 = vadd.f32 %v4856_v59, %v1573_v21  ;;  %v4355_v59 = vld [vmem:[%s4600_s16 + $0x2c0] sm:$0xff]   ;;  %v4374_v47 = vld [vmem:[%s4600_s16 + $0x268] sm:$0xff]   ;;  %v4378_v55 = vld [vmem:[%s4600_s16 + $0x270] sm:$0xff]  }
 0x9ef   : > { %v4372_v45 = vld [vmem:[%s4600_s16 + $0x220] sm:$0xff]   ;;  %v4377_v54 = vld [vmem:[%s4600_s16 + $0x2a8] sm:$0xff]   ;;  %v4380_v21 = vld [vmem:[%s4600_s16 + $0x230] sm:$0xff]  }
 0x9f0   : > { %v2123_v13 = vmax.f32 %v1947_v6, 0.0  ;;  %v4373_v46 = vld [vmem:[%s4600_s16 + $0x2a0] sm:$0xff]   ;;  %v4381_v61 = vld [vmem:[%s4600_s16 + $0x2b0] sm:$0xff]   ;;  %v4382_v62 = vld [vmem:[%s4600_s16 + $0x278] sm:$0xff]   ;;  %v2143_v6 = vpack.c.bf16 %v2127_v3, %v2127_v3 }
 0x9f1   : > { %4059 = vmatpush3.bf16.msra.mxu0 %v4344_v56  ;;  %4081 = vmatpush3.bf16.msra.mxu1 %v4345_v57  ;;  %v4379_v56 = vld [vmem:[%s4600_s16 + $0x2f0] sm:$0xff]   ;;  %v1601_v57 = vrot.slane %v4820_v20, %v1568_v40  ;;  %v2113_v40 = vadd.f32 %v4889_v53, %v1609_v60  ;;  %v2125_v20 = vmax.f32 %v4868_v22, 0.0  ;;  %v4389_v22 = vld [vmem:[%s4600_s16 + $0x380] sm:$0xff]   ;;  %v4400_v15 = vld [vmem:[%s4600_s16 + $0x318] sm:$0xff]  }
 0x9f2   : > { %4060 = vmatprep.subr.bf16.mxu0 %v4346_v63  ;;  %4082 = vmatprep.subr.bf16.mxu1 %v4347_v0  ;;  %v2139_v2 = vpack.c.bf16 %v2123_v13, %v2123_v13  ;;  %v4383_v63 = vld [vmem:[%s4600_s16 + $0x2f8] sm:$0xff]   ;;  %v4396_v13 = vld [vmem:[%s4600_s16 + $0x310] sm:$0xff]  }
 0x9f3   : > { %v2072_v0 = vadd.f32 %v4887_v52, %v1601_v57  ;;  %v2132_v5 = vmax.f32 %v2113_v40, 0.0  ;;  %v4388_v52 = vld [vmem:[%s4600_s16 + $0x300] sm:$0xff]   ;;  %v2141_v53 = vpack.c.bf16 %v2125_v20, %v2125_v20 }
 0x9f5   : > { %4061 = vmatpush3.bf16.msra.mxu0 %v4348_v19  ;;  %4083 = vmatpush3.bf16.msra.mxu1 %v4349_v24  ;;  %v4387_v19 = vld [vmem:[%s4600_s16 + $0x3c0] sm:$0xff]   ;;  %v2130_v24 = vmax.f32 %v2072_v0, 0.0  ;;  %v2148_v8 = vpack.c.bf16 %v2132_v5, %v2132_v5 }
 0x9f6   : > { %4062 = vmatprep.subr.bf16.mxu0 %v4350_v7  ;;  %4084 = vmatprep.subr.bf16.mxu1 %v4351_v25  ;;  %v4390_v7 = vld [vmem:[%s4600_s16 + $0x348] sm:$0xff]  }
 0x9f7   : > { %v2146_v25 = vpack.c.bf16 %v2130_v24, %v2130_v24 }
 0x9f9   : > { %4063 = vmatpush3.bf16.msra.mxu0 %v4352_v26  ;;  %4085 = vmatpush3.bf16.msra.mxu1 %v4353_v11  ;;  %v4393_v26 = vld [vmem:[%s4600_s16 + $0x388] sm:$0xff]   ;;  %v4394_v11 = vld [vmem:[%s4600_s16 + $0x350] sm:$0xff]  }
 0x9fa   : > { %4092 = vmatprep.subr.bf16.mxu0 %v4354_v58  ;;  %4114 = vmatprep.subr.bf16.mxu1 %v4355_v59  ;;  %v4397_v58 = vld [vmem:[%s4600_s16 + $0x390] sm:$0xff]   ;;  %v4398_v59 = vld [vmem:[%s4600_s16 + $0x358] sm:$0xff]  }
 0x9fc   : > { %3293 = vmatmul.mubr.bf16.vlgmr.msra.gmra.mrb[32].mxu0 %v2137_v17  ;;  %3333 = vmatmul.mubr.bf16.vlgmr.msra.gmra.mrb[36].mxu1 %v2139_v2  ;;  %v4402_v17 = vld [vmem:[%s4600_s16 + $0x360] sm:$0xff]  }
 0x9fd   : > { %4093 = vmatpush3.bf16.msra.mxu0 %v4356_v16  ;;  %3372 = vmatprep.mubr.bf16.mxu0 %v2142_v28  ;;  %v4401_v16 = vld [vmem:[%s4600_s16 + $0x398] sm:$0xff]   ;;  %v4403_v2 = vld [vmem:[%s4600_s16 + $0x3e0] sm:$0xff]  }
 0x9fe   : > { %4115 = vmatpush3.bf16.msra.mxu1 %v4357_v27  ;;  %3412 = vmatprep.mubr.bf16.mxu1 %v2144_v31  ;;  %v4404_v27 = vld [vmem:[%s4600_s16 + $0x320] sm:$0xff]   ;;  %v4408_v31 = vld [vmem:[%s4600_s16 + $0x328] sm:$0xff]  }
 0x9ff   : > { %4094 = vmatprep.subr.bf16.mxu0 %v4358_v29  ;;  %4116 = vmatprep.subr.bf16.mxu1 %v4359_v30  ;;  %v4405_v28 = vld [vmem:[%s4600_s16 + $0x3a0] sm:$0xff]   ;;  %v4406_v29 = vld [vmem:[%s4600_s16 + $0x368] sm:$0xff]  }
 0xa00   : > { %v4407_v30 = vld [vmem:[%s4600_s16 + $0x3e8] sm:$0xff]  }
 0xa01   : > { %4095 = vmatpush3.bf16.msra.mxu0 %v4360_v32  ;;  %v4409_v32 = vld [vmem:[%s4600_s16 + $0x3a8] sm:$0xff]  }
 0xa02   : > { %4117 = vmatpush3.bf16.msra.mxu1 %v4361_v33  ;;  %4096 = vmatprep.subr.bf16.mxu0 %v4362_v34  ;;  %v4410_v33 = vld [vmem:[%s4600_s16 + $0x370] sm:$0xff]  }
 0xa03   : > { %4118 = vmatprep.subr.bf16.mxu1 %v4363_v35  ;;  %v4411_v34 = vld [vmem:[%s4600_s16 + $0x3f0] sm:$0xff]  }
 0xa04   : > { %v4412_v35 = vld [vmem:[%s4600_s16 + $0x330] sm:$0xff]  }
 0xa05   : > { %4097 = vmatpush3.bf16.msra.mxu0 %v4364_v36  ;;  %v4413_v36 = vld [vmem:[%s4600_s16 + $0x3b0] sm:$0xff]  }
 0xa06   : > { %4119 = vmatpush3.bf16.msra.mxu1 %v4365_v37  ;;  %4098 = vmatprep.subr.bf16.mxu0 %v4366_v38  ;;  %v4414_v37 = vld [vmem:[%s4600_s16 + $0x378] sm:$0xff]  }
 0xa07   : > { %4120 = vmatprep.subr.bf16.mxu1 %v4367_v39  ;;  %v4415_v38 = vld [vmem:[%s4600_s16 + $0x3f8] sm:$0xff]  }
 0xa08   : > { %v4416_v39 = vld [vmem:[%s4600_s16 + $0x338] sm:$0xff]  }
 0xa09   : > { %4099 = vmatpush3.bf16.msra.mxu0 %v4368_v4  ;;  %v2129_v4 = vmax.f32 %v4882_v50, 0.0 }
 0xa0a   : > { %4121 = vmatpush3.bf16.msra.mxu1 %v4369_v42  ;;  %4100 = vmatprep.subr.bf16.mxu0 %v4370_v43  ;;  %v4417_v42 = vld [vmem:[%s4600_s16 + $0x3b8] sm:$0xff]   ;;  %v2131_v43 = vmax.f32 %v4885_v51, 0.0 }
 0xa0b   : > { %4122 = vmatprep.subr.bf16.mxu1 %v4371_v44  ;;  %v2145_v44 = vpack.c.bf16 %v2129_v4, %v2129_v4 }
 0xa0d   : > { %4101 = vmatpush3.bf16.msra.mxu0 %v4372_v45  ;;  %v2147_v45 = vpack.c.bf16 %v2131_v43, %v2131_v43 }
 0xa0e   : > { %4123 = vmatpush3.bf16.msra.mxu1 %v4373_v46  ;;  %4102 = vmatprep.subr.bf16.mxu0 %v4374_v47 }
 0xa0f   : > { %4124 = vmatprep.subr.bf16.mxu1 %v4375_v48  ;;  %v3842_v48 = vld [vmem:[%s642_s29] ss:$0 sm:$0xff] }
 0xa11   : > { %4103 = vmatpush3.bf16.msra.mxu0 %v4376_v49 }
 0xa12   : > { %4125 = vmatpush3.bf16.msra.mxu1 %v4377_v54  ;;  %4104 = vmatprep.subr.bf16.mxu0 %v4378_v55 }
 0xa13   : > { %4126 = vmatprep.subr.bf16.mxu1 %v4379_v56 }
 0xa15   : > { %4105 = vmatpush3.bf16.msra.mxu0 %v4380_v21 }
 0xa16   : > { %4127 = vmatpush3.bf16.msra.mxu1 %v4381_v61  ;;  %4106 = vmatprep.subr.bf16.mxu0 %v4382_v62 }
 0xa17   : > { %4128 = vmatprep.subr.bf16.mxu1 %v4383_v63 }
 0xa19   : > { %4107 = vmatpush3.bf16.msra.mxu0 %v4384_v18 }
 0xa1a   : > { %4129 = vmatpush3.bf16.msra.mxu1 %v4385_v41  ;;  %4136 = vmatprep.subr.bf16.mxu0 %v4386_v1 }
 0xa1b   : > { %4158 = vmatprep.subr.bf16.mxu1 %v4387_v19 }
 0xa1c   : > { %3373 = vmatmul.mubr.bf16.vlgmr.msra.gmra.mrb[36].mxu0 %v2141_v53 }
 0xa1d   : > { %3413 = vmatmul.mubr.bf16.vlgmr.msra.gmra.mrb[40].mxu1 %v2143_v6  ;;  %4137 = vmatpush3.bf16.msra.mxu0 %v4388_v52 }
 0xa1e   : > { %3452 = vmatprep.mubr.bf16.mxu0 %v2146_v25  ;;  %4159 = vmatpush3.bf16.msra.mxu1 %v4389_v22 }
 0xa1f   : > { %3492 = vmatprep.mubr.bf16.mxu1 %v2148_v8  ;;  %4138 = vmatprep.subr.bf16.mxu0 %v4390_v7 }
 0xa20   : > { %4160 = vmatprep.subr.bf16.mxu1 %v4391_v23 }
 0xa21   : > { %4139 = vmatpush3.bf16.msra.mxu0 %v4392_v10 }
 0xa22   : > { %4161 = vmatpush3.bf16.msra.mxu1 %v4393_v26  ;;  %4140 = vmatprep.subr.bf16.mxu0 %v4394_v11 }
 0xa23   : > { %4162 = vmatprep.subr.bf16.mxu1 %v4395_v12 }
 0xa25   : > { %4141 = vmatpush3.bf16.msra.mxu0 %v4396_v13 }
 0xa26   : > { %4163 = vmatpush3.bf16.msra.mxu1 %v4397_v58  ;;  %4142 = vmatprep.subr.bf16.mxu0 %v4398_v59 }
 0xa27   : > { %4164 = vmatprep.subr.bf16.mxu1 %v4399_v14 }
 0xa29   : > { %4143 = vmatpush3.bf16.msra.mxu0 %v4400_v15 }
 0xa2a   : > { %4165 = vmatpush3.bf16.msra.mxu1 %v4401_v16  ;;  %4144 = vmatprep.subr.bf16.mxu0 %v4402_v17 }
 0xa2b   : > { %4166 = vmatprep.subr.bf16.mxu1 %v4403_v2 }
 0xa2d   : > { %4145 = vmatpush3.bf16.msra.mxu0 %v4404_v27 }
 0xa2e   : > { %4167 = vmatpush3.bf16.msra.mxu1 %v4405_v28  ;;  %4146 = vmatprep.subr.bf16.mxu0 %v4406_v29 }
 0xa2f   : > { %4168 = vmatprep.subr.bf16.mxu1 %v4407_v30 }
 0xa31   : > { %4147 = vmatpush3.bf16.msra.mxu0 %v4408_v31 }
 0xa32   : > { %4169 = vmatpush3.bf16.msra.mxu1 %v4409_v32  ;;  %4148 = vmatprep.subr.bf16.mxu0 %v4410_v33 }
 0xa33   : > { %4170 = vmatprep.subr.bf16.mxu1 %v4411_v34 }
 0xa35   : > { %4149 = vmatpush3.bf16.msra.mxu0 %v4412_v35 }
 0xa36   : > { %4171 = vmatpush3.bf16.msra.mxu1 %v4413_v36  ;;  %4150 = vmatprep.subr.bf16.mxu0 %v4414_v37 }
 0xa37   : > { %4172 = vmatprep.subr.bf16.mxu1 %v4415_v38 }
 0xa39   : > { %4151 = vmatpush3.bf16.msra.mxu0 %v4416_v39 }
 0xa3a   : > { %4173 = vmatpush3.bf16.msra.mxu1 %v4417_v42 }
 0xa3c   : > { %3453 = vmatmul.mubr.bf16.vlgmr.msra.gmra.mrb[40].mxu0 %v2145_v44  ;;  %v3972_v44 = vld [vmem:[%s654_s28] ss:$0 sm:$0xff] }
 0xa3d   : > { %3493 = vmatmul.mubr.bf16.vlgmr.msra.gmra.mrb[44].mxu1 %v2147_v45 }
 0xaaf   : > { %v4020_v46 = vpop.f32.mrb[28].mxu0  ;;  %v4042_v47 = vpop.f32.mrb[32].mxu1 }
 0xab0   : > { %v4021_v50 = vpop.f32.mrb[29].mxu0  ;;  %v4043_v49 = vpop.f32.mrb[33].mxu1 }
 0xab1   : > { %v4022_v54 = vadd.f32 %v4021_v50, %v4020_v46  ;;  %v4044_v55 = vadd.f32 %v4043_v49, %v4042_v47  ;;  %v4023_v56 = vpop.f32.mrb[30].mxu0  ;;  %v4045_v51 = vpop.f32.mrb[34].mxu1  ;;  %v3535_v47 = vld [vmem:[%s5065_s18] sm:$0xff] (!%p3973_p5)  ;;  %v3537_v50 = vld [vmem:[%s5066_s27 + $0x10] sm:$0xff] (!%p3973_p5)  ;;  %v4467_v49 = vmov (!%p3973_p5), 0.0|0.0  }
 0xab2   : > { %v4024_v57 = vpop.f32.mrb[31].mxu0  ;;  %v4046_v60 = vpop.f32.mrb[35].mxu1  ;;  %4252 = vmatprep.subr.bf16.mxu0 (!%p3973_p5), %v4467_v49  ;;  %v4469_v56 = vmov (!%p3973_p5), 0.0  }
 0xab3   : > { %v3215_v21 = vadd.f32 %v4022_v54, %v3842_v48  ;;  %v3536_v48 = vld [vmem:[%s5066_s27 + $0x8] sm:$0xff] (!%p3973_p5)  ;;  %4249 = vmatprep.mubr.msk.f32.mxu0 (!%p3973_p5), %vm4468_vm6, %v4469_v56  ;;  %v3974_v57 = vld [vmem:[%s5067_s21] ss:$0 sm:$0xff] (!%p3973_p5) }
 0xab4   : > { %v4253_v54 = vpack.c.bf16 (!%p3973_p5), %v3536_v48, %v3535_v47 }
 0xab5   : > { %v3255_v61 = vadd.f32 %v4044_v55, %v3215_v21  ;;  %v3538_v55 = vld [vmem:[%s5066_s27 + $0x18] sm:$0xff] (!%p3973_p5) }
 0xab6   : > { %4254 = vmatpush3.bf16.msra.mxu0 (!%p3973_p5), %v4253_v54  ;;  %v4256_v51 = vpack.c.bf16 (!%p3973_p5), %v3538_v55, %v3537_v50 }
 0xab7   : > { %4255 = vmatprep.subr.bf16.mxu0 (!%p3973_p5), %v4467_v49 }
 0xaba   : > { %4257 = vmatpush3.bf16.msra.mxu0 (!%p3973_p5), %v4256_v51 }
 0xacf   : > { %v4064_v62 = vpop.f32.mrb[32].mxu0  ;;  %v4086_v63 = vpop.f32.mrb[36].mxu1 }
 0xad0   : > { %v4065_v0 = vpop.f32.mrb[33].mxu0  ;;  %v4087_v40 = vpop.f32.mrb[37].mxu1 }
 0xad1   : > { %v4066_v18 = vadd.f32 %v4065_v0, %v4064_v62  ;;  %v4088_v20 = vadd.f32 %v4087_v40, %v4086_v63  ;;  %v4067_v41 = vpop.f32.mrb[34].mxu0  ;;  %v4089_v1 = vpop.f32.mrb[38].mxu1 }
 0xad2   : > { %v4068_v3 = vpop.f32.mrb[35].mxu0  ;;  %v4090_v19 = vpop.f32.mrb[39].mxu1 }
 0xad3   : > { %v3295_v24 = vadd.f32 %v4066_v18, %v3255_v61 }
 0xad5   : > { %v3335_v5 = vadd.f32 %v4088_v20, %v3295_v24 }
 0xaef   : > { %v4108_v52 = vpop.f32.mrb[36].mxu0 }
 0xaf0   : > { %v4130_v53 = vpop.f32.mrb[40].mxu1  ;;  %v4109_v22 = vpop.f32.mrb[37].mxu0 }
 0xaf1   : > { %v4110_v6 = vadd.f32 %v4109_v22, %v4108_v52  ;;  %v4131_v7 = vpop.f32.mrb[41].mxu1  ;;  %v4111_v25 = vpop.f32.mrb[38].mxu0 }
 0xaf2   : > { %v4132_v23 = vadd.f32 %v4131_v7, %v4130_v53  ;;  %v4133_v8 = vpop.f32.mrb[42].mxu1  ;;  %v4112_v10 = vpop.f32.mrb[39].mxu0 }
 0xaf3   : > { %v3375_v26 = vadd.f32 %v4110_v6, %v3335_v5  ;;  %v4134_v11 = vpop.f32.mrb[43].mxu1 }
 0xaf5   : > { %v3415_v12 = vadd.f32 %v4132_v23, %v3375_v26 }
 0xb0f   : > { %v4152_v13 = vpop.f32.mrb[40].mxu0 }
 0xb10   : > { %v4174_v58 = vpop.f32.mrb[44].mxu1  ;;  %v4153_v59 = vpop.f32.mrb[41].mxu0 }
 0xb11   : > { %v4154_v14 = vadd.f32 %v4153_v59, %v4152_v13  ;;  %v4175_v15 = vpop.f32.mrb[45].mxu1  ;;  %v4155_v16 = vpop.f32.mrb[42].mxu0 }
 0xb12   : > { %v4176_v17 = vadd.f32 %v4175_v15, %v4174_v58  ;;  %v4177_v2 = vpop.f32.mrb[46].mxu1  ;;  %v4156_v27 = vpop.f32.mrb[43].mxu0 }
 0xb13   : > { %v3455_v28 = vadd.f32 %v4154_v14, %v3415_v12  ;;  %v4178_v29 = vpop.f32.mrb[47].mxu1 }
 0xb15   : > { %v3495_v30 = vadd.f32 %v4176_v17, %v3455_v28 }
 0xb17   : > { %v3500_v31 = vadd.f32 %v3495_v30, %v4738_v9  ;;  %v3971_v9 = vld [vmem:[%s651_s5] ss:$0 sm:$0xff] }
 0xb19   : > { %v3503_v32 = vsel %vm688_vm2, %v3500_v31, 0.0 }
 0xb1a   : > { %3504 = vadd.xlane.f32.xlu0 %v3503_v32 }
 0xba7   : > { %v3505_v33 = vpop.xlane.xlu0 %3504 }
 0xba8   : > { %v3506_v34 = vmul.f32 0.03125, %v3505_v33 }
 0xbaa   : > { %v3507_v35 = vsub.f32 %v3500_v31, %v3506_v34 }
 0xbac   : > { %v3508_v36 = vmul.f32 %v3507_v35, %v3507_v35 }
 0xbae   : > { %v3509_v37 = vsel %vm688_vm2, %v3508_v36, 0.0 }
 0xbaf   : > { %3510 = vadd.xlane.f32.xlu0 %v3509_v37 }
 0xc3c   : > { %v3511_v38 = vpop.xlane.xlu0 %3510 }
 0xc3d   : > { %v3512_v39 = vmul.f32 0.03125, %v3511_v38 }
 0xc3f   : > { %v3513_v4 = vadd.f32 1e-05, %v3512_v39 }
 0xc41   : > { %4436 = vrsqrt.f32 %v3513_v4 }
 0xc4b   : > { %v4437_v42 = vpop.eup %4436 }
 0xc4c   : > { %v3515_v43 = vmul.f32 %v4437_v42, %v3507_v35  ;;  %3534 = sbr.rel (%p3973_p5) target bundleno = 3397 (0xd45), region = 88 }
 0xc4e   : > { %v3522_v45 = vmul.f32 %v3971_v9, %v3515_v43 }
 0xc50   : > { %v3529_v46 = vadd.f32 %v3972_v44, %v3522_v45 }
 0xc52   : > { %3530 = vst.msk [vmem:[#allocation2] sm:$0xff] %vm688_vm2, %v3529_v46  ;;  %4250 = vmatmul.mubr.msk.f32.vlgmr.msra.gmra.mrb[0].mxu0 (!%p3973_p5), %vm688_vm2, %v3529_v46 }
 0xd25   : > { %v3615_v60 = vpop.f32.mrb[0].mxu0 }
 0xd26   : > { %v3616_v21 = vadd.f32 %v3974_v57, %v3615_v60  ;;  %v4251_v61 = vpop.f32.mrb[1].mxu0 }
 0xd28   : > { %v3619_v62 = vsub.f32 0.0, %v3616_v21 }
 0xd2a   : > { %v3620_v63 = vmul.f32 1.442695, %v3619_v62 }
 0xd2c   : > { %4438 = vpow2.f32 %v3620_v63 }
 0xd36   : > { %v4439_v0 = vpop.eup %4438 }
 0xd37   : > { %v3622_v40 = vadd.f32 1.0, %v4439_v0 }
 0xd39   : > { %4440 = vrcp.f32 %v3622_v40 }
 0xd43   : > { %v4441_v18 = vpop.eup %4440 }
 0xd44   : > { %3626 = vst.msk [vmem:[%s5068_s1] sm:$0xff] %vm3625_vm7, %v4441_v18 }
 0xd45 PF: > { %s5069_s3 = sld [smem:[#allocation3_spill]] }
 0xd4b   : > { %s25_s18 = sadd.s32 1, %s5069_s3  }
 0xd4c   : > { %p22_p6 = scmp.ge.s32.totalorder %s25_s18, 4  }
 0xd4e   :  { %24 = sbr.rel (!%p22_p6) target bundleno = 9 (0x9), region = 147 }

</bundles_post_ra>
